<compile_context>
chip_gen: v5e
topology: v5e:2x2
jax: 0.10.0
libtpu: 0.0.40
codegen_flags: <defaults>
</compile_context>

<pallas_src>
import numpy as np
import jax
import jax.numpy as jnp
from jax import lax
from jax.experimental import pallas as pl
from jax.experimental.pallas import tpu as pltpu


# --------------------------------------------------------------------------
# Hash-grid encoding (plain-JAX glue).
# TODO(synk): tcnn HashGrid hashing + trilinear interpolation is a
# data-dependent gather; fusing it into the Pallas kernel (tables fit easily
# in VMEM) is a possible further win but kept in JAX here.
# --------------------------------------------------------------------------
def hash_grid_encode(x, table, base_resolution, per_level_scale):
    """x: [N, 3] in [0, 1); table: [n_levels, table_size, n_feat] -> [N, n_levels*n_feat]."""
    n_levels, table_size, n_feat = table.shape
    primes = np.array([1, 2654435761, 805459861], dtype=np.uint32)
    outs = []
    for lvl in range(n_levels):
        res = int(np.floor(base_resolution * (per_level_scale ** lvl)))
        xs = x * res
        x0f = jnp.floor(xs)
        w = xs - x0f
        x0 = x0f.astype(jnp.int32)
        acc = jnp.zeros((x.shape[0], n_feat), dtype=jnp.float32)
        for corner in range(8):
            offs = np.array([(corner >> k) & 1 for k in range(3)], dtype=np.int32)
            c = (x0 + offs[None, :]).astype(jnp.uint32)
            h = (c[:, 0] * primes[0]) ^ (c[:, 1] * primes[1]) ^ (c[:, 2] * primes[2])
            idx = (h % np.uint32(table_size)).astype(jnp.int32)
            corner_feat = table[lvl][idx]                                   # [N, n_feat]
            wgt = jnp.prod(jnp.where(offs[None, :] == 1, w, 1.0 - w),
                           axis=-1, keepdims=True)
            acc = acc + wgt * corner_feat
        outs.append(acc)
    return jnp.concatenate(outs, axis=-1)


def mask_grid_features_mask(decayscale, n_levels, n_features_per_level):
    # TODO(synk): neural_fields.mask_grid_features window assumed to be a hard
    # per-level coarse-to-fine mask (level < n_levels * decayscale).
    lvl = np.arange(n_levels, dtype=np.float32)
    m = (lvl < n_levels * float(decayscale)).astype(np.float32)
    m = np.repeat(m, n_features_per_level)
    return jnp.asarray(m[None, :], dtype=jnp.float32)                       # [1, dim]


def _round_up(v, m):
    return ((v + m - 1) // m) * m


# --------------------------------------------------------------------------
# Pallas kernel: density MLP -> (VolSDF offset) -> color MLP -> fused output
# (masks are pre-folded into weights in the wrapper)
# --------------------------------------------------------------------------
def _make_kernel(n_density, n_color, base_radius, apply_sdf_offset,
                 render_color, features_color):
    def kernel(*refs):
        in_refs, out_ref = refs[:-1], refs[-1]
        it = iter(in_refs)
        x = next(it)[...]                                    # [TM, 3]  f32
        emb_d = next(it)[...]                                # [TM, ED] bf16
        emb_c = next(it)[...] if render_color else None      # [TM, EC] bf16

        # ---- density trunk (all-ReLU; mask folded into first weight rows) ----
        h = emb_d
        for _ in range(n_density - 1):
            W = next(it)[...]
            b = next(it)[...]
            h = jnp.maximum(
                jnp.dot(h.astype(W.dtype), W,
                        preferred_element_type=jnp.float32) + b, 0.0)

        # ---- final density linear: single MXU dot, columns = [features..., d] ----
        Wl = next(it)[...]                                   # [F, FC+1]
        bl = next(it)[...]                                   # [1, FC+1]
        res = jnp.dot(h.astype(Wl.dtype), Wl,
                      preferred_element_type=jnp.float32) + bl
        feat = res[:, :features_color]                       # [TM, FC]
        d = res[:, features_color:features_color + 1]        # [TM, 1]

        if apply_sdf_offset:
            d = d + jnp.sqrt(jnp.sum(x * x, axis=-1, keepdims=True)) - base_radius

        if not render_color:
            out_ref[...] = d
            return

        # ---- color network: cat([emb_color, feat]) @ W0  (W0 split by rows) ----
        W0e = next(it)[...]                                  # [EC, FC] (mask folded)
        W0f = next(it)[...]                                  # [FC, FC]
        b0 = next(it)[...]                                   # [1, FC]
        h2 = (jnp.dot(emb_c.astype(W0e.dtype), W0e, preferred_element_type=jnp.float32)
              + jnp.dot(feat.astype(W0f.dtype), W0f, preferred_element_type=jnp.float32)
              + b0)
        h2 = jnp.maximum(h2, 0.0)
        for li in range(n_color - 1):
            W = next(it)[...]
            b = next(it)[...]
            h2 = jnp.dot(h2.astype(W.dtype), W,
                         preferred_element_type=jnp.float32) + b
            if li < n_color - 2:                             # output activation = None
                h2 = jnp.maximum(h2, 0.0)

        # final color weight was zero-padded to 4 cols in the wrapper, so
        # h2 is [TM, 4] with col 3 == 0; select d into lane 3 and store once.
        lane = lax.broadcasted_iota(jnp.int32, h2.shape, 1)  # [TM, 4]
        out_ref[...] = jnp.where(lane == 3, d, h2)           # (rgb | d)

    return kernel


# --------------------------------------------------------------------------
# Wrapper (mirrors GridFeatureMLP.forward)
# --------------------------------------------------------------------------
def gridfeature_mlp_forward(mean, params, decayscales, *, base_radius=1.0,
                            parameterization='volsdf', render_color=True,
                            tile_m=2048, compute_dtype=jnp.bfloat16):
    batch_shape = mean.shape[:-1]
    assert mean.shape[-1] == 3
    n = int(np.prod(batch_shape))
    x = mean.reshape(n, 3).astype(jnp.float32)

    cfg_d = params['emb_density_config']
    cfg_c = params['emb_color_config']

    emb_d = hash_grid_encode(x, params['table_density'],
                             cfg_d['base_resolution'], cfg_d['per_level_scale'])
    mask_d = mask_grid_features_mask(decayscales['density'],
                                     cfg_d['n_levels'], cfg_d['n_features_per_level'])
    emb_d = emb_d.astype(compute_dtype)

    dens_layers = params['density_layers']      # list of (W [in,out], b [out])
    col_layers = params['color_layers']

    # fold coarse-to-fine mask into rows of the first density weight
    W0d, b0d = dens_layers[0]
    W0d = W0d * mask_d[0][:, None]

    # final density layer as one matmul; reorder columns to [features..., d]
    Wlast, blast = dens_layers[-1]
    Wl = jnp.concatenate([Wlast[:, 1:], Wlast[:, 0:1]], axis=1)        # [F, FC+1]
    bl = jnp.concatenate([blast[1:], blast[0:1]])[None, :]             # [1, FC+1]
    features_color = int(Wl.shape[1]) - 1

    apply_sdf = (parameterization == 'volsdf') and (base_radius is not None)

    def wcast(w):
        return w.astype(compute_dtype)

    inputs = [x, emb_d]
    if render_color:
        emb_c = hash_grid_encode(x, params['table_color'],
                                 cfg_c['base_resolution'], cfg_c['per_level_scale'])
        mask_c = mask_grid_features_mask(decayscales['color'],
                                         cfg_c['n_levels'], cfg_c['n_features_per_level'])
        emb_c = emb_c.astype(compute_dtype)
        inputs.append(emb_c)

    # density trunk weights (first one already masked)
    inputs += [wcast(W0d), b0d[None, :].astype(jnp.float32)]
    for W, b in dens_layers[1:-1]:
        inputs += [wcast(W), b[None, :].astype(jnp.float32)]
    inputs += [wcast(Wl), bl.astype(jnp.float32)]
    if render_color:
        W0, b0 = col_layers[0]
        ec_dim = emb_c.shape[-1]
        W0e = W0[:ec_dim, :] * mask_c[0][:, None]     # mask folded into rows
        W0f = W0[ec_dim:, :]
        inputs += [wcast(W0e), wcast(W0f), b0[None, :].astype(jnp.float32)]
        col_rest = list(col_layers[1:])
        # zero-pad the final color layer to 4 output columns so the kernel can
        # emit a fused [TM, 4] tile without any lane concatenation.
        Wc, bc = col_rest[-1]
        Wc4 = jnp.concatenate([Wc, jnp.zeros((Wc.shape[0], 1), Wc.dtype)], axis=1)
        bc4 = jnp.concatenate([bc, jnp.zeros((1,), bc.dtype)])
        col_rest[-1] = (Wc4, bc4)
        for W, b in col_rest:
            inputs += [wcast(W), b[None, :].astype(jnp.float32)]

    n_point_inputs = 3 if render_color else 2

    # large tile over points (amortizes ~0.35us/step overhead); no host-side
    # padding -- Pallas masks the partial boundary block.
    tile_m_eff = min(int(tile_m), _round_up(n, 8))
    grid = (pl.cdiv(n, tile_m_eff),)

    in_specs = []
    for k, arr in enumerate(inputs):
        if k < n_point_inputs:   # tiled along points
            in_specs.append(pl.BlockSpec((tile_m_eff, arr.shape[1]), lambda i: (i, 0)))
        else:                    # resident parameters: same block every step
            in_specs.append(pl.BlockSpec(arr.shape, lambda i: (0, 0)))

    if render_color:
        out_shape = jax.ShapeDtypeStruct((n, 4), jnp.float32)
        out_specs = pl.BlockSpec((tile_m_eff, 4), lambda i: (i, 0))
        out_bytes = n * 4 * 4
    else:
        out_shape = jax.ShapeDtypeStruct((n, 1), jnp.float32)
        out_specs = pl.BlockSpec((tile_m_eff, 1), lambda i: (i, 0))
        out_bytes = n * 4

    # advisory cost estimate
    flops_pp = 0
    for W, _ in dens_layers:
        flops_pp += 2 * int(W.shape[0]) * int(W.shape[1])
    if render_color:
        for W, _ in col_layers:
            flops_pp += 2 * int(W.shape[0]) * int(W.shape[1])
    bytes_accessed = sum(int(np.prod(a.shape)) * int(a.dtype.itemsize) for a in inputs)
    bytes_accessed += out_bytes
    cost = pl.CostEstimate(flops=int(flops_pp) * n,
                           transcendentals=int(n) if apply_sdf else 0,
                           bytes_accessed=int(bytes_accessed))

    kernel = _make_kernel(len(dens_layers), len(col_layers),
                          float(base_radius if base_radius is not None else 0.0),
                          apply_sdf, render_color, features_color)

    out = pl.pallas_call(
        kernel,
        out_shape=out_shape,
        grid=grid,
        in_specs=in_specs,
        out_specs=out_specs,
        compiler_params=pltpu.CompilerParams(dimension_semantics=("parallel",)),
        cost_estimate=cost,
    )(*inputs)

    if render_color:
        return out.reshape(*batch_shape, 4)
    return out[:, 0].reshape(batch_shape)


# --------------------------------------------------------------------------
# Deterministic synthetic parameter init (shapes mirror GridFeatureMLP.__init__)
# --------------------------------------------------------------------------
def init_params(key, *, features_density, layers_density, features_color,
                layers_color, emb_density_config, emb_color_config,
                parameterization='volsdf', base_radius=1.0):
    assert layers_density >= 2 and layers_color >= 2
    n_keys = layers_density + layers_color + 3
    keys = list(jax.random.split(key, n_keys))
    ki = iter(keys)

    def linear(k, fan_in, fan_out):
        bound = 1.0 / np.sqrt(fan_in)
        W = jax.random.uniform(k, (fan_in, fan_out), jnp.float32, -bound, bound)
        b = jnp.zeros((fan_out,), jnp.float32)
        return W, b

    ed_dim = emb_density_config['n_levels'] * emb_density_config['n_features_per_level']
    ec_dim = emb_color_config['n_levels'] * emb_color_config['n_features_per_level']

    # density: trunk (layers_density - 1 linears, all ReLU) + final Linear(F, FC+1)
    dims_d = [ed_dim] + [features_density] * (layers_density - 1) + [features_color + 1]
    density_layers = [linear(next(ki), dims_d[i], dims_d[i + 1])
                      for i in range(layers_density)]
    if parameterization == 'volsdf' and base_radius is not None:
        Wl, bl = density_layers[-1]
        Wl = Wl.at[:, 0].set(jax.random.uniform(
            next(ki), (Wl.shape[0],), jnp.float32, -0.1, 0.1))
        density_layers[-1] = (Wl, bl)
    else:
        next(ki)

    # color: Linear(EC+FC, FC) + hidden + Linear(FC, 3), output activation None
    dims_c = [ec_dim + features_color] + [features_color] * (layers_color - 1) + [3]
    color_layers = [linear(next(ki), dims_c[i], dims_c[i + 1])
                    for i in range(layers_color)]

    def table(k, cfg):
        T = 2 ** cfg['log2_hashmap_size']
        return jax.random.uniform(
            k, (cfg['n_levels'], T, cfg['n_features_per_level']),
            jnp.float32, -1e-1, 1e-1)

    return dict(
        emb_density_config=emb_density_config,
        emb_color_config=emb_color_config,
        table_density=table(next(ki), emb_density_config),
        table_color=table(next(ki), emb_color_config),
        density_layers=density_layers,
        color_layers=color_layers,
    )


if __name__ == "__main__":
    emb_density_config = dict(otype='HashGrid', n_levels=8, n_features_per_level=2,
                              log2_hashmap_size=12, base_resolution=4,
                              per_level_scale=1.5)
    emb_color_config = dict(otype='HashGrid', n_levels=8, n_features_per_level=2,
                            log2_hashmap_size=12, base_resolution=4,
                            per_level_scale=1.5)

    key = jax.random.PRNGKey(0)
    k_mean, k_params = jax.random.split(key)

    # mean is [D, *batch, 3]; here D=2, batch spatial = (16, 8) -> 256 points
    mean = jax.random.uniform(k_mean, (2, 16, 8, 3), jnp.float32)

    params = init_params(
        k_params,
        features_density=32, layers_density=3,
        features_color=16, layers_color=2,
        emb_density_config=emb_density_config,
        emb_color_config=emb_color_config,
        parameterization='volsdf', base_radius=1.0)

    decayscales = {'density': 0.5, 'color': 0.75}

    out = gridfeature_mlp_forward(
        mean, params, decayscales,
        base_radius=1.0, parameterization='volsdf',
        render_color=True, tile_m=2048)
    out = jax.block_until_ready(out)

    assert out.shape == (2, 16, 8, 4), out.shape
    assert out.dtype == jnp.float32
    assert bool(jnp.all(jnp.isfinite(out)))
    print("KERNEL_OK")
</pallas_src>

<mosaic_0001>
module attributes {stable_mosaic.version = 11 : i64} {
  func.func @kernel(%arg0: i32, %arg1: memref<256x3xf32, #tpu.memory_space<vmem>>, %arg2: memref<256x16xbf16, #tpu.memory_space<vmem>>, %arg3: memref<256x16xbf16, #tpu.memory_space<vmem>>, %arg4: memref<16x32xbf16, #tpu.memory_space<vmem>>, %arg5: memref<1x32xf32, #tpu.memory_space<vmem>>, %arg6: memref<32x32xbf16, #tpu.memory_space<vmem>>, %arg7: memref<1x32xf32, #tpu.memory_space<vmem>>, %arg8: memref<32x17xbf16, #tpu.memory_space<vmem>>, %arg9: memref<1x17xf32, #tpu.memory_space<vmem>>, %arg10: memref<16x16xbf16, #tpu.memory_space<vmem>>, %arg11: memref<16x16xbf16, #tpu.memory_space<vmem>>, %arg12: memref<1x16xf32, #tpu.memory_space<vmem>>, %arg13: memref<16x4xbf16, #tpu.memory_space<vmem>>, %arg14: memref<1x4xf32, #tpu.memory_space<vmem>>, %arg15: memref<256x4xf32, #tpu.memory_space<vmem>>) attributes {dimension_semantics = [#tpu.dimension_semantics<parallel>], iteration_bounds = array<i64: 1>, scalar_prefetch = 0 : i64, scratch_operands = 0 : i64, tpu.core_type = #tpu.core_type<tc>, window_params = [{transform_indices = @transform_0, window_bounds = array<i64: 256, 3>}, {transform_indices = @transform_1, window_bounds = array<i64: 256, 16>}, {transform_indices = @transform_2, window_bounds = array<i64: 256, 16>}, {pipeline_mode = #tpu.pipeline_mode<synchronous>, transform_indices = @transform_3, window_bounds = array<i64: 16, 32>}, {pipeline_mode = #tpu.pipeline_mode<synchronous>, transform_indices = @transform_4, window_bounds = array<i64: 1, 32>}, {pipeline_mode = #tpu.pipeline_mode<synchronous>, transform_indices = @transform_5, window_bounds = array<i64: 32, 32>}, {pipeline_mode = #tpu.pipeline_mode<synchronous>, transform_indices = @transform_6, window_bounds = array<i64: 1, 32>}, {pipeline_mode = #tpu.pipeline_mode<synchronous>, transform_indices = @transform_7, window_bounds = array<i64: 32, 17>}, {pipeline_mode = #tpu.pipeline_mode<synchronous>, transform_indices = @transform_8, window_bounds = array<i64: 1, 17>}, {pipeline_mode = #tpu.pipeline_mode<synchronous>, transform_indices = @transform_9, window_bounds = array<i64: 16, 16>}, {pipeline_mode = #tpu.pipeline_mode<synchronous>, transform_indices = @transform_10, window_bounds = array<i64: 16, 16>}, {pipeline_mode = #tpu.pipeline_mode<synchronous>, transform_indices = @transform_11, window_bounds = array<i64: 1, 16>}, {pipeline_mode = #tpu.pipeline_mode<synchronous>, transform_indices = @transform_12, window_bounds = array<i64: 16, 4>}, {pipeline_mode = #tpu.pipeline_mode<synchronous>, transform_indices = @transform_13, window_bounds = array<i64: 1, 4>}, {transform_indices = @transform_14, window_bounds = array<i64: 256, 4>}]} {
    %c0 = arith.constant 0 : index
    %c0_0 = arith.constant 0 : index
    %0 = vector.load %arg1[%c0, %c0_0] : memref<256x3xf32, #tpu.memory_space<vmem>>, vector<256x3xf32>
    %c0_1 = arith.constant 0 : index
    %c0_2 = arith.constant 0 : index
    %1 = vector.load %arg2[%c0_1, %c0_2] : memref<256x16xbf16, #tpu.memory_space<vmem>>, vector<256x16xbf16>
    %c0_3 = arith.constant 0 : index
    %c0_4 = arith.constant 0 : index
    %2 = vector.load %arg3[%c0_3, %c0_4] : memref<256x16xbf16, #tpu.memory_space<vmem>>, vector<256x16xbf16>
    %c0_5 = arith.constant 0 : index
    %c0_6 = arith.constant 0 : index
    %3 = vector.load %arg4[%c0_5, %c0_6] : memref<16x32xbf16, #tpu.memory_space<vmem>>, vector<16x32xbf16>
    %c0_7 = arith.constant 0 : index
    %c0_8 = arith.constant 0 : index
    %4 = vector.load %arg5[%c0_7, %c0_8] : memref<1x32xf32, #tpu.memory_space<vmem>>, vector<1x32xf32>
    %cst = arith.constant dense<0.000000e+00> : vector<256x32xf32>
    %5 = tpu.matmul %1, %3, %cst {dimension_numbers = #tpu.dot_dimension_numbers<[1], [0], [0], [1], [0, 0, 1, 1], [], []>} : vector<256x16xbf16>, vector<16x32xbf16>, vector<256x32xf32> -> vector<256x32xf32>
    %6 = vector.broadcast %4 : vector<1x32xf32> to vector<256x32xf32>
    %7 = arith.addf %5, %6 : vector<256x32xf32>
    %cst_9 = arith.constant 0.000000e+00 : f32
    %8 = vector.broadcast %cst_9 : f32 to vector<256x32xf32>
    %9 = arith.maximumf %7, %8 : vector<256x32xf32>
    %c0_10 = arith.constant 0 : index
    %c0_11 = arith.constant 0 : index
    %10 = vector.load %arg6[%c0_10, %c0_11] : memref<32x32xbf16, #tpu.memory_space<vmem>>, vector<32x32xbf16>
    %c0_12 = arith.constant 0 : index
    %c0_13 = arith.constant 0 : index
    %11 = vector.load %arg7[%c0_12, %c0_13] : memref<1x32xf32, #tpu.memory_space<vmem>>, vector<1x32xf32>
    %12 = arith.truncf %9 : vector<256x32xf32> to vector<256x32xbf16>
    %cst_14 = arith.constant dense<0.000000e+00> : vector<256x32xf32>
    %13 = tpu.matmul %12, %10, %cst_14 {dimension_numbers = #tpu.dot_dimension_numbers<[1], [0], [0], [1], [0, 0, 1, 1], [], []>} : vector<256x32xbf16>, vector<32x32xbf16>, vector<256x32xf32> -> vector<256x32xf32>
    %14 = vector.broadcast %11 : vector<1x32xf32> to vector<256x32xf32>
    %15 = arith.addf %13, %14 : vector<256x32xf32>
    %cst_15 = arith.constant 0.000000e+00 : f32
    %16 = vector.broadcast %cst_15 : f32 to vector<256x32xf32>
    %17 = arith.maximumf %15, %16 : vector<256x32xf32>
    %c0_16 = arith.constant 0 : index
    %c0_17 = arith.constant 0 : index
    %18 = vector.load %arg8[%c0_16, %c0_17] : memref<32x17xbf16, #tpu.memory_space<vmem>>, vector<32x17xbf16>
    %c0_18 = arith.constant 0 : index
    %c0_19 = arith.constant 0 : index
    %19 = vector.load %arg9[%c0_18, %c0_19] : memref<1x17xf32, #tpu.memory_space<vmem>>, vector<1x17xf32>
    %20 = arith.truncf %17 : vector<256x32xf32> to vector<256x32xbf16>
    %cst_20 = arith.constant dense<0.000000e+00> : vector<256x17xf32>
    %21 = tpu.matmul %20, %18, %cst_20 {dimension_numbers = #tpu.dot_dimension_numbers<[1], [0], [0], [1], [0, 0, 1, 1], [], []>} : vector<256x32xbf16>, vector<32x17xbf16>, vector<256x17xf32> -> vector<256x17xf32>
    %22 = vector.broadcast %19 : vector<1x17xf32> to vector<256x17xf32>
    %23 = arith.addf %21, %22 : vector<256x17xf32>
    %24 = vector.extract_strided_slice %23 {offsets = [0, 0], sizes = [256, 16], strides = [1, 1]} : vector<256x17xf32> to vector<256x16xf32>
    %25 = vector.extract_strided_slice %23 {offsets = [0, 16], sizes = [256, 1], strides = [1, 1]} : vector<256x17xf32> to vector<256x1xf32>
    %26 = arith.mulf %0, %0 : vector<256x3xf32>
    %cst_21 = arith.constant dense<0.000000e+00> : vector<256xf32>
    %27 = vector.multi_reduction <add>, %26, %cst_21 [1] : vector<256x3xf32> to vector<256xf32>
    %28 = vector.shape_cast %27 : vector<256xf32> to vector<256x1xf32>
    %29 = math.sqrt %28 : vector<256x1xf32>
    %30 = arith.addf %25, %29 : vector<256x1xf32>
    %cst_22 = arith.constant 1.000000e+00 : f32
    %31 = vector.broadcast %cst_22 : f32 to vector<256x1xf32>
    %32 = arith.subf %30, %31 : vector<256x1xf32>
    %c0_23 = arith.constant 0 : index
    %c0_24 = arith.constant 0 : index
    %33 = vector.load %arg10[%c0_23, %c0_24] : memref<16x16xbf16, #tpu.memory_space<vmem>>, vector<16x16xbf16>
    %c0_25 = arith.constant 0 : index
    %c0_26 = arith.constant 0 : index
    %34 = vector.load %arg11[%c0_25, %c0_26] : memref<16x16xbf16, #tpu.memory_space<vmem>>, vector<16x16xbf16>
    %c0_27 = arith.constant 0 : index
    %c0_28 = arith.constant 0 : index
    %35 = vector.load %arg12[%c0_27, %c0_28] : memref<1x16xf32, #tpu.memory_space<vmem>>, vector<1x16xf32>
    %cst_29 = arith.constant dense<0.000000e+00> : vector<256x16xf32>
    %36 = tpu.matmul %2, %33, %cst_29 {dimension_numbers = #tpu.dot_dimension_numbers<[1], [0], [0], [1], [0, 0, 1, 1], [], []>} : vector<256x16xbf16>, vector<16x16xbf16>, vector<256x16xf32> -> vector<256x16xf32>
    %37 = arith.truncf %24 : vector<256x16xf32> to vector<256x16xbf16>
    %cst_30 = arith.constant dense<0.000000e+00> : vector<256x16xf32>
    %38 = tpu.matmul %37, %34, %cst_30 {dimension_numbers = #tpu.dot_dimension_numbers<[1], [0], [0], [1], [0, 0, 1, 1], [], []>} : vector<256x16xbf16>, vector<16x16xbf16>, vector<256x16xf32> -> vector<256x16xf32>
    %39 = arith.addf %36, %38 : vector<256x16xf32>
    %40 = vector.broadcast %35 : vector<1x16xf32> to vector<256x16xf32>
    %41 = arith.addf %39, %40 : vector<256x16xf32>
    %cst_31 = arith.constant 0.000000e+00 : f32
    %42 = vector.broadcast %cst_31 : f32 to vector<256x16xf32>
    %43 = arith.maximumf %41, %42 : vector<256x16xf32>
    %c0_32 = arith.constant 0 : index
    %c0_33 = arith.constant 0 : index
    %44 = vector.load %arg13[%c0_32, %c0_33] : memref<16x4xbf16, #tpu.memory_space<vmem>>, vector<16x4xbf16>
    %c0_34 = arith.constant 0 : index
    %c0_35 = arith.constant 0 : index
    %45 = vector.load %arg14[%c0_34, %c0_35] : memref<1x4xf32, #tpu.memory_space<vmem>>, vector<1x4xf32>
    %46 = arith.truncf %43 : vector<256x16xf32> to vector<256x16xbf16>
    %cst_36 = arith.constant dense<0.000000e+00> : vector<256x4xf32>
    %47 = tpu.matmul %46, %44, %cst_36 {dimension_numbers = #tpu.dot_dimension_numbers<[1], [0], [0], [1], [0, 0, 1, 1], [], []>} : vector<256x16xbf16>, vector<16x4xbf16>, vector<256x4xf32> -> vector<256x4xf32>
    %48 = vector.broadcast %45 : vector<1x4xf32> to vector<256x4xf32>
    %49 = arith.addf %47, %48 : vector<256x4xf32>
    %50 = tpu.iota {dimensions = array<i32: 1>} : vector<256x4xi32>
    %c3_i32 = arith.constant 3 : i32
    %51 = vector.broadcast %c3_i32 : i32 to vector<256x4xi32>
    %52 = arith.cmpi eq, %50, %51 : vector<256x4xi32>
    %53 = vector.shape_cast %32 : vector<256x1xf32> to vector<256x1xf32>
    %54 = vector.broadcast %53 : vector<256x1xf32> to vector<256x4xf32>
    %55 = arith.select %52, %54, %49 : vector<256x4xi1>, vector<256x4xf32>
    %c0_37 = arith.constant 0 : index
    %c0_38 = arith.constant 0 : index
    %56 = vector.load %arg15[%c0_37, %c0_38] : memref<256x4xf32, #tpu.memory_space<vmem>>, vector<256x4xf32>
    tpu.vector_store %arg15[%c0_37, %c0_38], %55 {strides = array<i32>} : memref<256x4xf32, #tpu.memory_space<vmem>>, vector<256x4xf32>,
    return
  }
  func.func @transform_0(%arg0: i32) -> (i32, i32) {
    %c0_i32 = arith.constant 0 : i32
    %c0_i32_0 = arith.constant 0 : i32
    return %arg0, %c0_i32 : i32, i32
  }
  func.func @transform_1(%arg0: i32) -> (i32, i32) {
    %c0_i32 = arith.constant 0 : i32
    %c0_i32_0 = arith.constant 0 : i32
    return %arg0, %c0_i32 : i32, i32
  }
  func.func @transform_2(%arg0: i32) -> (i32, i32) {
    %c0_i32 = arith.constant 0 : i32
    %c0_i32_0 = arith.constant 0 : i32
    return %arg0, %c0_i32 : i32, i32
  }
  func.func @transform_3(%arg0: i32) -> (i32, i32) {
    %c0_i32 = arith.constant 0 : i32
    %c0_i32_0 = arith.constant 0 : i32
    %c0_i32_1 = arith.constant 0 : i32
    return %c0_i32, %c0_i32_0 : i32, i32
  }
  func.func @transform_4(%arg0: i32) -> (i32, i32) {
    %c0_i32 = arith.constant 0 : i32
    %c0_i32_0 = arith.constant 0 : i32
    %c0_i32_1 = arith.constant 0 : i32
    return %c0_i32, %c0_i32_0 : i32, i32
  }
  func.func @transform_5(%arg0: i32) -> (i32, i32) {
    %c0_i32 = arith.constant 0 : i32
    %c0_i32_0 = arith.constant 0 : i32
    %c0_i32_1 = arith.constant 0 : i32
    return %c0_i32, %c0_i32_0 : i32, i32
  }
  func.func @transform_6(%arg0: i32) -> (i32, i32) {
    %c0_i32 = arith.constant 0 : i32
    %c0_i32_0 = arith.constant 0 : i32
    %c0_i32_1 = arith.constant 0 : i32
    return %c0_i32, %c0_i32_0 : i32, i32
  }
  func.func @transform_7(%arg0: i32) -> (i32, i32) {
    %c0_i32 = arith.constant 0 : i32
    %c0_i32_0 = arith.constant 0 : i32
    %c0_i32_1 = arith.constant 0 : i32
    return %c0_i32, %c0_i32_0 : i32, i32
  }
  func.func @transform_8(%arg0: i32) -> (i32, i32) {
    %c0_i32 = arith.constant 0 : i32
    %c0_i32_0 = arith.constant 0 : i32
    %c0_i32_1 = arith.constant 0 : i32
    return %c0_i32, %c0_i32_0 : i32, i32
  }
  func.func @transform_9(%arg0: i32) -> (i32, i32) {
    %c0_i32 = arith.constant 0 : i32
    %c0_i32_0 = arith.constant 0 : i32
    %c0_i32_1 = arith.constant 0 : i32
    return %c0_i32, %c0_i32_0 : i32, i32
  }
  func.func @transform_10(%arg0: i32) -> (i32, i32) {
    %c0_i32 = arith.constant 0 : i32
    %c0_i32_0 = arith.constant 0 : i32
    %c0_i32_1 = arith.constant 0 : i32
    return %c0_i32, %c0_i32_0 : i32, i32
  }
  func.func @transform_11(%arg0: i32) -> (i32, i32) {
    %c0_i32 = arith.constant 0 : i32
    %c0_i32_0 = arith.constant 0 : i32
    %c0_i32_1 = arith.constant 0 : i32
    return %c0_i32, %c0_i32_0 : i32, i32
  }
  func.func @transform_12(%arg0: i32) -> (i32, i32) {
    %c0_i32 = arith.constant 0 : i32
    %c0_i32_0 = arith.constant 0 : i32
    %c0_i32_1 = arith.constant 0 : i32
    return %c0_i32, %c0_i32_0 : i32, i32
  }
  func.func @transform_13(%arg0: i32) -> (i32, i32) {
    %c0_i32 = arith.constant 0 : i32
    %c0_i32_0 = arith.constant 0 : i32
    %c0_i32_1 = arith.constant 0 : i32
    return %c0_i32, %c0_i32_0 : i32, i32
  }
  func.func @transform_14(%arg0: i32) -> (i32, i32) {
    %c0_i32 = arith.constant 0 : i32
    %c0_i32_0 = arith.constant 0 : i32
    return %arg0, %c0_i32 : i32, i32
  }
}

</mosaic_0001>

<bundles_post_ra>
// kernel: tpu_custom_call.1
= control target key start
LH: loop header
LB: loop body
LE: loop exit
PB: predicated region body
PF: predicated region fallthrough
CT: control target
= control target key end

     0   :  { %vm236_vm0 = vcmask 130048   ;;  %vm442_vm1 = vcmask 261120   ;;  %vm817_vm2 = vcmask 23552   ;;  %s3928_s3 = inlined_call_operand.vmem [shape: bf16[16,32], index: 3, kind: input, shape index: {}]   ;;  %s3929_s1 = inlined_call_operand.vmem [shape: bf16[256,16], index: 1, kind: input, shape index: {}]   ;;  %s3930_s5 = inlined_call_operand.vmem [shape: bf16[32,32], index: 5, kind: input, shape index: {}]   ;;  %s3931_s4 = inlined_call_operand.vmem [shape: f32[1,32], index: 4, kind: input, shape index: {}]   ;;  %s3932_s6 = inlined_call_operand.vmem [shape: f32[1,32], index: 6, kind: input, shape index: {}]   ;;  %s3933_s7 = inlined_call_operand.vmem [shape: bf16[32,17], index: 7, kind: input, shape index: {}]   ;;  %s3934_s0 = inlined_call_operand.vmem [shape: f32[256,3], index: 0, kind: input, shape index: {}]   ;;  %s3935_s10 = inlined_call_operand.vmem [shape: bf16[16,16], index: 10, kind: input, shape index: {}]   ;;  %s3936_s8 = inlined_call_operand.vmem [shape: f32[1,17], index: 8, kind: input, shape index: {}]   ;;  %s3937_s9 = inlined_call_operand.vmem [shape: bf16[16,16], index: 9, kind: input, shape index: {}]   ;;  %s3938_s2 = inlined_call_operand.vmem [shape: bf16[256,16], index: 2, kind: input, shape index: {}]   ;;  %s3939_s12 = inlined_call_operand.vmem [shape: bf16[16,4], index: 12, kind: input, shape index: {}]   ;;  %s3940_s11 = inlined_call_operand.vmem [shape: f32[1,16], index: 11, kind: input, shape index: {}]   ;;  %s3941_s13 = inlined_call_operand.vmem [shape: f32[1,4], index: 13, kind: input, shape index: {}]   ;;  %s3942_s14 = inlined_call_operand.vmem [shape: f32[256,4], index: 14, kind: output, shape index: {}]  }
   0x1   :  { %v2533_v0 = vld [vmem:[%s3928_s3] sm:$0xff]  ;;  %v2510_v2 = vld [vmem:[%s3929_s1 + $0x48] sm:$0xff]  ;;  %v2511_v5 = vld [vmem:[%s3929_s1 + $0x50] sm:$0xff] }
   0x2   :  { %v2501_v1 = vld [vmem:[%s3929_s1] sm:$0xff]  ;;  %v2535_v3 = vld [vmem:[%s3930_s5 + $0x8] sm:$0xff]  ;;  %292 = vmatpush.bf16.msra.mxu0 %v2533_v0  ;;  %2541 = vmatpush.bf16.msra.mxu1 %v2533_v0  ;;  %v2503_v6 = vld [vmem:[%s3929_s1 + $0x10] sm:$0xff] }
   0x3   :  { %v2502_v4 = vld [vmem:[%s3929_s1 + $0x8] sm:$0xff]  ;;  %v2512_v7 = vld [vmem:[%s3929_s1 + $0x58] sm:$0xff]  ;;  %v2513_v9 = vld [vmem:[%s3929_s1 + $0x60] sm:$0xff] }
   0x4   :  { %v2504_v8 = vld [vmem:[%s3929_s1 + $0x18] sm:$0xff]  ;;  %v2534_v10 = vld [vmem:[%s3930_s5] sm:$0xff]  ;;  %v2514_v12 = vld [vmem:[%s3929_s1 + $0x68] sm:$0xff] }
   0x5   :  { %2281 = vmatmul.msk.bf16.vlgmr.msra.gmra.mxu0 %vm236_vm0, %v2501_v1  ;;  %2290 = vmatmul.msk.bf16.vlgmr.msra.gmra.mxu1 %vm236_vm0, %v2510_v2  ;;  %v2505_v11 = vld [vmem:[%s3929_s1 + $0x20] sm:$0xff]  ;;  %v2506_v13 = vld [vmem:[%s3929_s1 + $0x28] sm:$0xff]  ;;  %v2515_v14 = vld [vmem:[%s3929_s1 + $0x70] sm:$0xff] }
   0x6   :  { %497 = vmatpush.bf16.msrb.mxu1 %v2535_v3  ;;  %v2507_v15 = vld [vmem:[%s3929_s1 + $0x30] sm:$0xff]  ;;  %v2516_v16 = vld [vmem:[%s3929_s1 + $0x78] sm:$0xff]  ;;  %v2509_v18 = vld [vmem:[%s3929_s1 + $0x40] sm:$0xff] }
   0x7   :  { %v2508_v17 = vld [vmem:[%s3929_s1 + $0x38] sm:$0xff]  ;;  %v2771_v21 = vld [vmem:[%s3931_s4] ss:$0 sm:$0xff] }
   0xa   :  { %498 = vmatpush.bf16.msrb.mxu1 %v2534_v10 }
  0x15   :  { %2282 = vmatmul.msk.bf16.gmra.mxu0 %vm236_vm0, %v2502_v4  ;;  %2291 = vmatmul.msk.bf16.gmra.mxu1 %vm236_vm0, %v2511_v5 }
  0x25   :  { %2283 = vmatmul.msk.bf16.gmra.mxu0 %vm236_vm0, %v2503_v6  ;;  %2292 = vmatmul.msk.bf16.gmra.mxu1 %vm236_vm0, %v2512_v7 }
  0x35   :  { %2284 = vmatmul.msk.bf16.gmra.mxu0 %vm236_vm0, %v2504_v8  ;;  %2293 = vmatmul.msk.bf16.gmra.mxu1 %vm236_vm0, %v2513_v9 }
  0x45   :  { %2285 = vmatmul.msk.bf16.gmra.mxu0 %vm236_vm0, %v2505_v11  ;;  %2294 = vmatmul.msk.bf16.gmra.mxu1 %vm236_vm0, %v2514_v12 }
  0x55   :  { %2286 = vmatmul.msk.bf16.gmra.mxu0 %vm236_vm0, %v2506_v13  ;;  %2295 = vmatmul.msk.bf16.gmra.mxu1 %vm236_vm0, %v2515_v14 }
  0x65   :  { %2287 = vmatmul.msk.bf16.gmra.mxu0 %vm236_vm0, %v2507_v15  ;;  %2296 = vmatmul.msk.bf16.gmra.mxu1 %vm236_vm0, %v2516_v16 }
  0x75   :  { %2288 = vmatmul.msk.bf16.gmra.mxu0 %vm236_vm0, %v2508_v17 }
  0x82   :  { %v294_v19 = vpop.f32.mrf.mxu0  ;;  %v2766_v20 = vpop.f32.mrf.mxu1 }
  0x83   :  { %v295_v22 = vadd.f32 %v2771_v21, %v294_v19  ;;  %v48_v19 = vld [vmem:[%s3934_s0] sm:$0xff] }
  0x85   :  { %2289 = vmatmul.msk.bf16.gmra.mxu0 %vm236_vm0, %v2509_v18  ;;  %v374_v25 = vmax.f32 %v295_v22, 0.0  ;;  %v2537_v18 = vld [vmem:[%s3933_s7 + $0x8] sm:$0xff]  ;;  %v785_v22 = vmul.f32 %v48_v19, %v48_v19 }
  0x86   :  { %702 = vmatpush.bf16.msra.mxu2 %v2537_v18 }
  0x8a   :  { %v296_v23 = vpop.f32.mrf.mxu0  ;;  %v2776_v27 = vpop.f32.mrf.mxu1 }
  0x8b   :  { %v297_v24 = vadd.f32 %v2771_v21, %v296_v23  ;;  %v2536_v23 = vld [vmem:[%s3933_s7] sm:$0xff] }
  0x8c   :  { %703 = vmatpush.bf16.msra.mxu2 %v2536_v23 }
  0x8d   :  { %v375_v26 = vmax.f32 %v297_v24, 0.0 }
  0x8f   :  { %v411_v28 = vpack.c.bf16 %v375_v26, %v374_v25  ;;  %v818_v25 = vsel %vm817_vm2, %v785_v22, 0.0 }
  0x90   :  { %819 = vadd.xlane.f32.xlu0 %v818_v25 }
  0x91   :  { %2305 = vmatmul.msk.bf16.vlgmr.msrb.gmra.mxu1 %vm442_vm1, %v411_v28 }
  0x92   :  { %v299_v29 = vpop.f32.mrf.mxu0  ;;  %v2779_v30 = vpop.f32.mrf.mxu1 }
  0x93   :  { %v300_v31 = vadd.f32 %v2771_v21, %v299_v29  ;;  %v345_v18 = vadd.f32 %v2771_v21, %v2779_v30 }
  0x95   :  { %v376_v34 = vmax.f32 %v300_v31, 0.0 }
  0x9a   :  { %v301_v32 = vpop.f32.mrf.mxu0  ;;  %v2784_v38 = vpop.f32.mrf.mxu1 }
  0x9b   :  { %v302_v33 = vadd.f32 %v2771_v21, %v301_v32  ;;  %v347_v19 = vadd.f32 %v2771_v21, %v2784_v38 }
  0x9d   :  { %v377_v35 = vmax.f32 %v302_v33, 0.0  ;;  %v2539_v33 = vld [vmem:[%s3935_s10] sm:$0xff] }
  0x9e   :  { %1444 = vmatpush.bf16.msrb.mxu2 %v2539_v33  ;;  %2542 = vmatpush.bf16.msra.mxu3 %v2539_v33 }
  0x9f   :  { %v412_v36 = vpack.c.bf16 %v377_v35, %v376_v34  ;;  %v49_v34 = vld [vmem:[%s3934_s0 + $0x8] sm:$0xff] }
  0xa1   :  { %2306 = vmatmul.msk.bf16.gmra.mxu1 %vm442_vm1, %v412_v36  ;;  %v786_v36 = vmul.f32 %v49_v34, %v49_v34 }
  0xa2   :  { %v304_v37 = vpop.f32.mrf.mxu0  ;;  %v2788_v42 = vpop.f32.mrf.mxu1 }
  0xa3   :  { %v305_v39 = vadd.f32 %v2771_v21, %v304_v37  ;;  %v821_v37 = vsel %vm817_vm2, %v786_v36, 0.0 }
  0xa4   :  { %822 = vadd.xlane.f32.xlu0 %v821_v37 }
  0xa5   :  { %v378_v43 = vmax.f32 %v305_v39, 0.0 }
  0xaa   :  { %v306_v40 = vpop.f32.mrf.mxu0  ;;  %v2791_v47 = vpop.f32.mrf.mxu1 }
  0xab   :  { %v307_v41 = vadd.f32 %v2771_v21, %v306_v40 }
  0xad   :  { %v379_v44 = vmax.f32 %v307_v41, 0.0  ;;  %v50_v41 = vld [vmem:[%s3934_s0 + $0x10] sm:$0xff] }
  0xaf   :  { %v413_v45 = vpack.c.bf16 %v379_v44, %v378_v43  ;;  %v787_v43 = vmul.f32 %v50_v41, %v50_v41  ;;  %v59_v41 = vld [vmem:[%s3934_s0 + $0x58] sm:$0xff] }
  0xb1   :  { %2307 = vmatmul.msk.bf16.gmra.mxu1 %vm442_vm1, %v413_v45  ;;  %v824_v45 = vsel %vm817_vm2, %v787_v43, 0.0  ;;  %v796_v43 = vmul.f32 %v59_v41, %v59_v41 }
  0xb2   :  { %v309_v46 = vpop.f32.mrf.mxu0  ;;  %v2795_v54 = vpop.f32.mrf.mxu1  ;;  %825 = vadd.xlane.f32.xlu1 %v824_v45 }
  0xb3   :  { %v310_v48 = vadd.f32 %v2771_v21, %v309_v46  ;;  %v851_v45 = vsel %vm817_vm2, %v796_v43, 0.0 }
  0xb5   :  { %v380_v51 = vmax.f32 %v310_v48, 0.0 }
  0xba   :  { %v311_v49 = vpop.f32.mrf.mxu0  ;;  %v2799_v58 = vpop.f32.mrf.mxu1 }
  0xbb   :  { %v312_v50 = vadd.f32 %v2771_v21, %v311_v49 }
  0xbd   :  { %v381_v52 = vmax.f32 %v312_v50, 0.0 }
  0xbf   :  { %v414_v53 = vpack.c.bf16 %v381_v52, %v380_v51  ;;  %v51_v52 = vld [vmem:[%s3934_s0 + $0x18] sm:$0xff] }
  0xc1   :  { %2308 = vmatmul.msk.bf16.gmra.mxu1 %vm442_vm1, %v414_v53 }
  0xc2   :  { %v314_v55 = vpop.f32.mrf.mxu0  ;;  %v2803_v0 = vpop.f32.mrf.mxu1 }
  0xc3   :  { %v315_v56 = vadd.f32 %v2771_v21, %v314_v55  ;;  %v788_v55 = vmul.f32 %v51_v52, %v51_v52 }
  0xc5   :  { %v382_v60 = vmax.f32 %v315_v56, 0.0  ;;  %v2853_v56 = vld [vmem:[%s3932_s6] ss:$0 sm:$0xff] }
  0xca   :  { %v316_v57 = vpop.f32.mrf.mxu0  ;;  %v2807_v6 = vpop.f32.mrf.mxu1 }
  0xcb   :  { %v317_v59 = vadd.f32 %v2771_v21, %v316_v57  ;;  %v827_v57 = vsel %vm817_vm2, %v788_v55, 0.0 }
  0xcc   :  { %828 = vadd.xlane.f32.xlu1 %v827_v57 }
  0xcd   :  { %v383_v61 = vmax.f32 %v317_v59, 0.0 }
  0xcf   :  { %v415_v62 = vpack.c.bf16 %v383_v61, %v382_v60  ;;  %v52_v61 = vld [vmem:[%s3934_s0 + $0x20] sm:$0xff] }
  0xd1   :  { %2309 = vmatmul.msk.bf16.gmra.mxu1 %vm442_vm1, %v415_v62  ;;  %v340_v62 = vadd.f32 %v2771_v21, %v2766_v20  ;;  %v53_v20 = vld [vmem:[%s3934_s0 + $0x28] sm:$0xff] }
  0xd2   :  { %v319_v63 = vpop.f32.mrf.mxu0  ;;  %v2810_v9 = vpop.f32.mrf.mxu1 }
  0xd3   :  { %v320_v1 = vadd.f32 %v2771_v21, %v319_v63  ;;  %v342_v63 = vadd.f32 %v2771_v21, %v2776_v27  ;;  %v790_v27 = vmul.f32 %v53_v20, %v53_v20 }
  0xd5   :  { %v384_v4 = vmax.f32 %v320_v1, 0.0 }
  0xda   :  { %v321_v2 = vpop.f32.mrf.mxu0  ;;  %v2815_v16 = vpop.f32.mrf.mxu1 }
  0xdb   :  { %v322_v3 = vadd.f32 %v2771_v21, %v321_v2  ;;  %v789_v2 = vmul.f32 %v52_v61, %v52_v61 }
  0xdd   :  { %v385_v5 = vmax.f32 %v322_v3, 0.0 }
  0xdf   :  { %v416_v7 = vpack.c.bf16 %v385_v5, %v384_v4  ;;  %v830_v5 = vsel %vm817_vm2, %v789_v2, 0.0  ;;  %v65_v2 = vld [vmem:[%s3934_s0 + $0x88] sm:$0xff] }
  0xe0   :  { %831 = vadd.xlane.f32.xlu2 %v830_v5 }
  0xe1   :  { %2310 = vmatmul.msk.bf16.gmra.mxu1 %vm442_vm1, %v416_v7  ;;  %v392_v7 = vmax.f32 %v340_v62, 0.0 }
  0xe2   :  { %v324_v8 = vpop.f32.mrf.mxu0  ;;  %v2829_v29 = vpop.f32.mrf.mxu1 }
  0xe3   :  { %v325_v10 = vadd.f32 %v2771_v21, %v324_v8  ;;  %v393_v8 = vmax.f32 %v342_v63, 0.0 }
  0xe5   :  { %v386_v13 = vmax.f32 %v325_v10, 0.0 }
  0xea   :  { %v326_v11 = vpop.f32.mrf.mxu0  ;;  %v2839_v40 = vpop.f32.mrf.mxu1 }
  0xeb   :  { %v327_v12 = vadd.f32 %v2771_v21, %v326_v11 }
  0xed   :  { %v387_v14 = vmax.f32 %v327_v12, 0.0  ;;  %v420_v12 = vpack.c.bf16 %v393_v8, %v392_v7 }
  0xef   :  { %v417_v15 = vpack.c.bf16 %v387_v14, %v386_v13  ;;  %v833_v13 = vsel %vm817_vm2, %v790_v27, 0.0 }
  0xf0   :  { %834 = vadd.xlane.f32.xlu2 %v833_v13  ;;  %v60_v13 = vld [vmem:[%s3934_s0 + $0x60] sm:$0xff] }
  0xf1   :  { %2311 = vmatmul.msk.bf16.gmra.mxu1 %vm442_vm1, %v417_v15 }
  0xf2   :  { %v329_v17 = vpop.f32.mrf.mxu0 }
  0xf3   :  { %v330_v24 = vadd.f32 %v2771_v21, %v329_v17  ;;  %v54_v17 = vld [vmem:[%s3934_s0 + $0x30] sm:$0xff] }
  0xf4   :  { %v791_v23 = vmul.f32 %v54_v17, %v54_v17 }
  0xf5   :  { %v388_v31 = vmax.f32 %v330_v24, 0.0 }
  0xfa   :  { %v331_v26 = vpop.f32.mrf.mxu0 }
  0xfb   :  { %v332_v28 = vadd.f32 %v2771_v21, %v331_v26  ;;  %v836_v26 = vsel %vm817_vm2, %v791_v23, 0.0 }
  0xfc   :  { %837 = vadd.xlane.f32.xlu0 %v836_v26 }
  0xfd   :  { %v389_v32 = vmax.f32 %v332_v28, 0.0  ;;  %v56_v28 = vld [vmem:[%s3934_s0 + $0x40] sm:$0xff] }
  0xfe   :  { %v793_v34 = vmul.f32 %v56_v28, %v56_v28 }
  0xff   :  { %v418_v35 = vpack.c.bf16 %v389_v32, %v388_v31  ;;  %v394_v31 = vmax.f32 %v345_v18, 0.0  ;;  %v395_v32 = vmax.f32 %v347_v19, 0.0 }
 0x100   :  { %v842_v30 = vsel %vm817_vm2, %v793_v34, 0.0 }
 0x101   :  { %2312 = vmatmul.msk.bf16.gmra.mxu1 %vm442_vm1, %v418_v35  ;;  %843 = vadd.xlane.f32.xlu2 %v842_v30  ;;  %v55_v35 = vld [vmem:[%s3934_s0 + $0x38] sm:$0xff]  ;;  %v421_v36 = vpack.c.bf16 %v395_v32, %v394_v31 }
 0x102   :  { %v334_v39 = vpop.f32.mrf.mxu0  ;;  %v792_v37 = vmul.f32 %v55_v35, %v55_v35  ;;  %v64_v35 = vld [vmem:[%s3934_s0 + $0x80] sm:$0xff] }
 0x103   :  { %v335_v44 = vadd.f32 %v2771_v21, %v334_v39 }
 0x104   :  { %v839_v39 = vsel %vm817_vm2, %v792_v37, 0.0  ;;  %v801_v37 = vmul.f32 %v64_v35, %v64_v35 }
 0x105   :  { %v390_v49 = vmax.f32 %v335_v44, 0.0  ;;  %840 = vadd.xlane.f32.xlu1 %v839_v39 }
 0x106   :  { %v866_v43 = vsel %vm817_vm2, %v801_v37, 0.0  ;;  %v3013_v37 = vpop.xlane.xlu0 %819 }
 0x107   :  { %2552 = vrsqrt.f32 %v3013_v37  ;;  %vm921_vm3 = vcmp.eq.f32.partialorder %v3013_v37, inf  ;;  %vm923_vm4 = vcmp.eq.f32.partialorder %v3013_v37, 0.0 }
 0x109   :  { %852 = vadd.xlane.f32.xlu2 %v851_v45 }
 0x10a   :  { %v336_v46 = vpop.f32.mrf.mxu0 }
 0x10b   :  { %v337_v48 = vadd.f32 %v2771_v21, %v336_v46 }
 0x10d   :  { %v391_v50 = vmax.f32 %v337_v48, 0.0  ;;  %v350_v48 = vadd.f32 %v2771_v21, %v2788_v42 }
 0x10e   :  { %v500_v51 = vpop.f32.mrf.mxu1 }
 0x10f   :  { %v419_v53 = vpack.c.bf16 %v391_v50, %v390_v49  ;;  %v501_v59 = vadd.f32 %v2853_v56, %v500_v51  ;;  %v352_v49 = vadd.f32 %v2771_v21, %v2791_v47  ;;  %v396_v55 = vmax.f32 %v350_v48, 0.0  ;;  %v57_v47 = vld [vmem:[%s3934_s0 + $0x48] sm:$0xff] }
 0x110   :  { %v794_v63 = vmul.f32 %v57_v47, %v57_v47 }
 0x111   :  { %2313 = vmatmul.msk.bf16.gmra.mxu1 %vm442_vm1, %v419_v53  ;;  %v580_v3 = vmax.f32 %v501_v59, 0.0  ;;  %v62_v53 = vld [vmem:[%s3934_s0 + $0x70] sm:$0xff]  ;;  %v397_v57 = vmax.f32 %v352_v49, 0.0 }
 0x112   :  { %v66_v49 = vld [vmem:[%s3934_s0 + $0x90] sm:$0xff] }
 0x113   :  { %v422_v62 = vpack.c.bf16 %v397_v57, %v396_v55 }
 0x116   :  { %v502_v60 = vpop.f32.mrf.mxu1 }
 0x117   :  { %v503_v1 = vadd.f32 %v2853_v56, %v502_v60  ;;  %v799_v60 = vmul.f32 %v62_v53, %v62_v53 }
 0x119   :  { %v581_v4 = vmax.f32 %v503_v1, 0.0  ;;  %v860_v61 = vsel %vm817_vm2, %v799_v60, 0.0  ;;  %v845_v1 = vsel %vm817_vm2, %v794_v63, 0.0 }
 0x11a   :  { %861 = vadd.xlane.f32.xlu2 %v860_v61  ;;  %846 = vadd.xlane.f32.xlu0 %v845_v1  ;;  %v69_v1 = vld [vmem:[%s3934_s0 + $0xa8] sm:$0xff] }
 0x11b   :  { %v617_v10 = vpack.c.bf16 %v581_v4, %v580_v3  ;;  %v58_v3 = vld [vmem:[%s3934_s0 + $0x50] sm:$0xff]  ;;  %v802_v4 = vmul.f32 %v65_v2, %v65_v2  ;;  %v806_v2 = vmul.f32 %v69_v1, %v69_v1 }
 0x11c   :  { %v795_v5 = vmul.f32 %v58_v3, %v58_v3 }
 0x11d   :  { %2329 = vmatmul.msk.bf16.vlgmr.msra.gmra.mxu2 %vm442_vm1, %v617_v10  ;;  %v869_v8 = vsel %vm817_vm2, %v802_v4, 0.0  ;;  %v881_v3 = vsel %vm817_vm2, %v806_v2, 0.0  ;;  %v77_v4 = vld [vmem:[%s3934_s0 + $0xe8] sm:$0xff] }
 0x11e   :  { %v505_v11 = vpop.f32.mrf.mxu1  ;;  %v848_v10 = vsel %vm817_vm2, %v795_v5, 0.0  ;;  %v70_v5 = vld [vmem:[%s3934_s0 + $0xb0] sm:$0xff] }
 0x11f   :  { %v506_v14 = vadd.f32 %v2853_v56, %v505_v11  ;;  %v355_v11 = vadd.f32 %v2771_v21, %v2795_v54  ;;  %849 = vadd.xlane.f32.xlu1 %v848_v10  ;;  %v68_v54 = vld [vmem:[%s3934_s0 + $0xa0] sm:$0xff] }
 0x121   :  { %2314 = vmatmul.msk.bf16.gmra.mxu1 %vm442_vm1, %v420_v12  ;;  %v582_v24 = vmax.f32 %v506_v14, 0.0  ;;  %v357_v12 = vadd.f32 %v2771_v21, %v2799_v58  ;;  %v797_v14 = vmul.f32 %v60_v13, %v60_v13  ;;  %v398_v18 = vmax.f32 %v355_v11, 0.0  ;;  %v61_v58 = vld [vmem:[%s3934_s0 + $0x68] sm:$0xff] }
 0x122   :  { %870 = vadd.xlane.f32.xlu2 %v869_v8  ;;  %v807_v8 = vmul.f32 %v70_v5, %v70_v5  ;;  %v367_v13 = vadd.f32 %v2771_v21, %v2815_v16 }
 0x123   :  { %v854_v19 = vsel %vm817_vm2, %v797_v14, 0.0 }
 0x124   :  { %855 = vadd.xlane.f32.xlu0 %v854_v19 }
 0x126   :  { %v507_v15 = vpop.f32.mrf.mxu1 }
 0x127   :  { %v508_v22 = vadd.f32 %v2853_v56, %v507_v15 }
 0x129   :  { %v583_v25 = vmax.f32 %v508_v22, 0.0  ;;  %v399_v22 = vmax.f32 %v357_v12, 0.0 }
 0x12b   :  { %v618_v33 = vpack.c.bf16 %v583_v25, %v582_v24  ;;  %v805_v24 = vmul.f32 %v68_v54, %v68_v54  ;;  %v798_v25 = vmul.f32 %v61_v58, %v61_v58  ;;  %v423_v32 = vpack.c.bf16 %v399_v22, %v398_v18  ;;  %v73_v58 = vld [vmem:[%s3934_s0 + $0xc8] sm:$0xff] }
 0x12c   :  { %v810_v16 = vmul.f32 %v73_v58, %v73_v58 }
 0x12d   :  { %2330 = vmatmul.msk.bf16.gmra.mxu2 %vm442_vm1, %v618_v33  ;;  %v878_v26 = vsel %vm817_vm2, %v805_v24, 0.0  ;;  %v857_v28 = vsel %vm817_vm2, %v798_v25, 0.0  ;;  %v63_v33 = vld [vmem:[%s3934_s0 + $0x78] sm:$0xff] }
 0x12e   :  { %v510_v38 = vpop.f32.mrf.mxu1  ;;  %879 = vadd.xlane.f32.xlu2 %v878_v26  ;;  %858 = vadd.xlane.f32.xlu1 %v857_v28  ;;  %v800_v34 = vmul.f32 %v63_v33, %v63_v33  ;;  %v893_v24 = vsel %vm817_vm2, %v810_v16, 0.0  ;;  %v75_v28 = vld [vmem:[%s3934_s0 + $0xd8] sm:$0xff] }
 0x12f   :  { %v511_v44 = vadd.f32 %v2853_v56, %v510_v38  ;;  %v71_v38 = vld [vmem:[%s3934_s0 + $0xb8] sm:$0xff] }
 0x130   :  { %v863_v30 = vsel %vm817_vm2, %v800_v34, 0.0  ;;  %v76_v34 = vld [vmem:[%s3934_s0 + $0xe0] sm:$0xff] }
 0x131   :  { %2315 = vmatmul.msk.bf16.gmra.mxu1 %vm442_vm1, %v421_v36  ;;  %v584_v51 = vmax.f32 %v511_v44, 0.0  ;;  %864 = vadd.xlane.f32.xlu0 %v863_v30  ;;  %v808_v36 = vmul.f32 %v71_v38, %v71_v38  ;;  %v360_v44 = vadd.f32 %v2771_v21, %v2803_v0  ;;  %v74_v0 = vld [vmem:[%s3934_s0 + $0xd0] sm:$0xff]  ;;  %v813_v30 = vmul.f32 %v76_v34, %v76_v34 }
 0x132   :  { %v811_v60 = vmul.f32 %v74_v0, %v74_v0  ;;  %v3030_v0 = vpop.xlane.xlu0 %822 }
 0x133   :  { %v887_v41 = vsel %vm817_vm2, %v808_v36, 0.0  ;;  %v400_v53 = vmax.f32 %v360_v44, 0.0  ;;  %v902_v35 = vsel %vm817_vm2, %v813_v30, 0.0  ;;  %v78_v44 = vld [vmem:[%s3934_s0 + $0xf0] sm:$0xff]  ;;  %2554 = vrsqrt.f32 %v3030_v0 }
 0x134   :  { %vm933_vm5 = vcmp.eq.f32.partialorder %v3030_v0, inf  ;;  %vm935_vm6 = vcmp.eq.f32.partialorder %v3030_v0, 0.0 }
 0x136   :  { %v512_v46 = vpop.f32.mrf.mxu1  ;;  %888 = vadd.xlane.f32.xlu2 %v887_v41  ;;  %867 = vadd.xlane.f32.xlu1 %v866_v43  ;;  %v372_v41 = vadd.f32 %v2771_v21, %v2839_v40 }
 0x137   :  { %v513_v50 = vadd.f32 %v2853_v56, %v512_v46  ;;  %v362_v46 = vadd.f32 %v2771_v21, %v2807_v6  ;;  %v67_v6 = vld [vmem:[%s3934_s0 + $0x98] sm:$0xff] }
 0x138   :  { %v804_v61 = vmul.f32 %v67_v6, %v67_v6  ;;  %v2553_v6 = vpop.eup %2552 }
 0x139   :  { %v585_v52 = vmax.f32 %v513_v50, 0.0  ;;  %v803_v50 = vmul.f32 %v66_v49, %v66_v49  ;;  %v401_v57 = vmax.f32 %v362_v46, 0.0 }
 0x13a   :  { %v875_v47 = vsel %vm817_vm2, %v804_v61, 0.0  ;;  %v3036_v61 = vpop.xlane.xlu1 %825 }
 0x13b   :  { %v619_v59 = vpack.c.bf16 %v585_v52, %v584_v51  ;;  %v872_v55 = vsel %vm817_vm2, %v803_v50, 0.0  ;;  %v424_v63 = vpack.c.bf16 %v401_v57, %v400_v53  ;;  %v79_v50 = vld [vmem:[%s3934_s0 + $0xf8] sm:$0xff]  ;;  %2556 = vrsqrt.f32 %v3036_v61 }
 0x13c   :  { %873 = vadd.xlane.f32.xlu0 %v872_v55  ;;  %vm945_vm7 = vcmp.eq.f32.partialorder %v3036_v61, inf  ;;  %vm947_vm8 = vcmp.eq.f32.partialorder %v3036_v61, 0.0 }
 0x13d   :  { %2331 = vmatmul.msk.bf16.gmra.mxu2 %vm442_vm1, %v619_v59 }
 0x13e   :  { %v515_v42 = vpop.f32.mrf.mxu1  ;;  %876 = vadd.xlane.f32.xlu1 %v875_v47 }
 0x13f   :  { %v516_v7 = vadd.f32 %v2853_v56, %v515_v42  ;;  %v896_v42 = vsel %vm817_vm2, %v811_v60, 0.0 }
 0x140   :  { %897 = vadd.xlane.f32.xlu2 %v896_v42  ;;  %v2618_v42 = vmov 16  }
 0x141   :  { %2316 = vmatmul.msk.bf16.gmra.mxu1 %vm442_vm1, %v422_v62  ;;  %v586_v15 = vmax.f32 %v516_v7, 0.0  ;;  %v814_v7 = vmul.f32 %v77_v4, %v77_v4  ;;  %2544 = vset.pattern.permute.xlu2 %v2618_v42 }
 0x142   :  { %2545 = vset.pattern.permute.xlu0 %v2618_v42  ;;  %2546 = vset.pattern.permute.xlu1 %v2618_v42 }
 0x143   :  { %v905_v11 = vsel %vm817_vm2, %v814_v7, 0.0 }
 0x144   :  { %882 = vadd.xlane.f32.xlu0 %v881_v3 }
 0x146   :  { %v517_v20 = vpop.f32.mrf.mxu1 }
 0x147   :  { %v518_v27 = vadd.f32 %v2853_v56, %v517_v20  ;;  %v884_v20 = vsel %vm817_vm2, %v807_v8, 0.0  ;;  %v3042_v8 = vpop.xlane.xlu1 %828 }
 0x148   :  { %906 = vadd.xlane.f32.xlu2 %v905_v11  ;;  %885 = vadd.xlane.f32.xlu1 %v884_v20  ;;  %v2517_v20 = vld [vmem:[%s3938_s2] sm:$0xff]  ;;  %2558 = vrsqrt.f32 %v3042_v8  ;;  %vm957_vm9 = vcmp.eq.f32.partialorder %v3042_v8, inf  ;;  %vm959_vm10 = vcmp.eq.f32.partialorder %v3042_v8, 0.0 }
 0x149   :  { %v587_v17 = vmax.f32 %v518_v27, 0.0  ;;  %v365_v27 = vadd.f32 %v2771_v21, %v2810_v9  ;;  %v403_v9 = vmax.f32 %v367_v13, 0.0 }
 0x14b   :  { %v620_v23 = vpack.c.bf16 %v587_v17, %v586_v15  ;;  %v72_v15 = vld [vmem:[%s3934_s0 + $0xc0] sm:$0xff]  ;;  %v402_v22 = vmax.f32 %v365_v27, 0.0 }
 0x14c   :  { %v809_v17 = vmul.f32 %v72_v15, %v72_v15 }
 0x14d   :  { %2332 = vmatmul.msk.bf16.gmra.mxu2 %vm442_vm1, %v620_v23  ;;  %v425_v26 = vpack.c.bf16 %v403_v9, %v402_v22 }
 0x14e   :  { %v520_v31 = vpop.f32.mrf.mxu1  ;;  %v890_v54 = vsel %vm817_vm2, %v809_v17, 0.0 }
 0x14f   :  { %v521_v39 = vadd.f32 %v2853_v56, %v520_v31  ;;  %891 = vadd.xlane.f32.xlu0 %v890_v54  ;;  %v812_v31 = vmul.f32 %v75_v28, %v75_v28 }
 0x150   :  { %894 = vadd.xlane.f32.xlu1 %v893_v24 }
 0x151   :  { %2317 = vmatmul.msk.bf16.gmra.mxu1 %vm442_vm1, %v423_v32  ;;  %v588_v51 = vmax.f32 %v521_v39, 0.0  ;;  %v2538_v32 = vld [vmem:[%s3937_s9] sm:$0xff]  ;;  %v899_v33 = vsel %vm817_vm2, %v812_v31, 0.0  ;;  %v370_v39 = vadd.f32 %v2771_v21, %v2829_v29  ;;  %v405_v29 = vmax.f32 %v372_v41, 0.0 }
 0x152   :  { %1667 = vmatpush.bf16.msrb.mxu0 %v2538_v32  ;;  %v816_v21 = vmul.f32 %v79_v50, %v79_v50  ;;  %v3063_v31 = vld [vmem:[%s3936_s8] ss:$0 sm:$0xff] }
 0x154   :  { %v911_v40 = vsel %vm817_vm2, %v816_v21, 0.0 }
 0x155   :  { %2465 = vmatmul.msk.bf16.vlgmr.msrb.gmra.mxu0 %vm236_vm0, %v2517_v20 }
 0x156   :  { %v522_v45 = vpop.f32.mrf.mxu1 }
 0x157   :  { %v523_v48 = vadd.f32 %v2853_v56, %v522_v45  ;;  %900 = vadd.xlane.f32.xlu0 %v899_v33  ;;  %v815_v45 = vmul.f32 %v78_v44, %v78_v44 }
 0x158   :  { %903 = vadd.xlane.f32.xlu1 %v902_v35 }
 0x159   :  { %v589_v52 = vmax.f32 %v523_v48, 0.0  ;;  %v908_v49 = vsel %vm817_vm2, %v815_v45, 0.0 }
 0x15b   :  { %v621_v59 = vpack.c.bf16 %v589_v52, %v588_v51  ;;  %v404_v51 = vmax.f32 %v370_v39, 0.0 }
 0x15d   :  { %2333 = vmatmul.msk.bf16.gmra.mxu2 %vm442_vm1, %v621_v59  ;;  %v426_v55 = vpack.c.bf16 %v405_v29, %v404_v51  ;;  %v915_v59 = vmul.f32 %v2553_v6, %v3013_v37 }
 0x15e   :  { %v525_v62 = vpop.f32.mrf.mxu1 }
 0x15f   :  { %v526_v10 = vadd.f32 %v2853_v56, %v525_v62  ;;  %909 = vadd.xlane.f32.xlu0 %v908_v49  ;;  %v2555_v62 = vpop.eup %2554  ;;  %v916_v2 = vmul.f32 %v2553_v6, %v915_v59 }
 0x160   :  { %912 = vadd.xlane.f32.xlu1 %v911_v40  ;;  %v927_v4 = vmul.f32 %v2555_v62, %v3030_v0 }
 0x161   :  { %2318 = vmatmul.msk.bf16.gmra.mxu1 %vm442_vm1, %v424_v63  ;;  %v590_v18 = vmax.f32 %v526_v10, 0.0  ;;  %v917_v5 = vmul.f32 0.5, %v916_v2 }
 0x162   :  { %v928_v10 = vmul.f32 %v2555_v62, %v927_v4 }
 0x163   :  { %v918_v11 = vsub.f32 1.5, %v917_v5 }
 0x164   :  { %v929_v27 = vmul.f32 0.5, %v928_v10 }
 0x165   :  { %v919_v15 = vmul.f32 %v2553_v6, %v918_v11 }
 0x166   :  { %v527_v12 = vpop.f32.mrf.mxu1  ;;  %v930_v54 = vsub.f32 1.5, %v929_v27 }
 0x167   :  { %v528_v14 = vadd.f32 %v2853_v56, %v527_v12  ;;  %v2557_v12 = vpop.eup %2556 }
 0x168   :  { %v2559_v58 = vpop.eup %2558  ;;  %v931_v28 = vmul.f32 %v2555_v62, %v930_v54 }
 0x169   :  { %v591_v19 = vmax.f32 %v528_v14, 0.0  ;;  %v939_v14 = vmul.f32 %v2557_v12, %v3036_v61 }
 0x16a   :  { %v932_v35 = vmul.f32 %v931_v28, %v3030_v0 }
 0x16b   :  { %v622_v23 = vpack.c.bf16 %v591_v19, %v590_v18  ;;  %v3051_v18 = vpop.xlane.xlu2 %831  ;;  %v940_v16 = vmul.f32 %v2557_v12, %v939_v14 }
 0x16c   :  { %2560 = vrsqrt.f32 %v3051_v18  ;;  %vm969_vm11 = vcmp.eq.f32.partialorder %v3051_v18, inf  ;;  %vm971_vm12 = vcmp.eq.f32.partialorder %v3051_v18, 0.0 }
 0x16d   :  { %2334 = vmatmul.msk.bf16.gmra.mxu2 %vm442_vm1, %v622_v23  ;;  %v920_v23 = vmul.f32 %v919_v15, %v3013_v37  ;;  %v941_v33 = vmul.f32 0.5, %v940_v16 }
 0x16e   :  { %v530_v25 = vpop.f32.mrf.mxu1 }
 0x16f   :  { %v531_v38 = vadd.f32 %v2853_v56, %v530_v25  ;;  %v924_v25 = vand.u32 2147483648, %v3013_v37  ;;  %v922_v32 = vsel %vm921_vm3, %v3013_v37, %v920_v23  ;;  %v942_v44 = vsub.f32 1.5, %v941_v33  ;;  %v2518_v37 = vld [vmem:[%s3938_s2 + $0x8] sm:$0xff] }
 0x170   :  { %2466 = vmatmul.msk.bf16.gmra.mxu0 %vm236_vm0, %v2518_v37 }
 0x171   :  { %2319 = vmatmul.msk.bf16.gmra.mxu1 %vm442_vm1, %v425_v26  ;;  %v592_v46 = vmax.f32 %v531_v38, 0.0  ;;  %v951_v26 = vmul.f32 %v2559_v58, %v3042_v8  ;;  %v925_v38 = vsel %vm923_vm4, %v924_v25, %v922_v32 }
 0x172   :  { %v2561_v41 = vpop.eup %2560 }
 0x173   :  { %v952_v39 = vmul.f32 %v2559_v58, %v951_v26  ;;  %v963_v49 = vmul.f32 %v2561_v41, %v3051_v18 }
 0x175   :  { %v953_v50 = vmul.f32 0.5, %v952_v39 }
 0x176   :  { %v532_v36 = vpop.f32.mrf.mxu1 }
 0x177   :  { %v533_v43 = vadd.f32 %v2853_v56, %v532_v36  ;;  %v3068_v36 = vpop.xlane.xlu2 %834  ;;  %v954_v6 = vsub.f32 1.5, %v953_v50  ;;  %v972_v50 = vand.u32 2147483648, %v3051_v18 }
 0x178   :  { %2562 = vrsqrt.f32 %v3068_v36  ;;  %v3106_v15 = vpop.xlane.xlu1 %840  ;;  %vm981_vm13 = vcmp.eq.f32.partialorder %v3068_v36, inf  ;;  %vm983_vm14 = vcmp.eq.f32.partialorder %v3068_v36, 0.0 }
 0x179   :  { %v593_v48 = vmax.f32 %v533_v43, 0.0  ;;  %v955_v5 = vmul.f32 %v2559_v58, %v954_v6  ;;  %vm1005_vm3 = vcmp.eq.f32.partialorder %v3106_v15, inf  ;;  %vm1007_vm4 = vcmp.eq.f32.partialorder %v3106_v15, 0.0 }
 0x17b   :  { %v623_v52 = vpack.c.bf16 %v593_v48, %v592_v46  ;;  %v934_v46 = vsel %vm933_vm5, %v3030_v0, %v932_v35  ;;  %v936_v48 = vand.u32 2147483648, %v3030_v0 }
 0x17d   :  { %2335 = vmatmul.msk.bf16.gmra.mxu2 %vm442_vm1, %v623_v52  ;;  %v943_v52 = vmul.f32 %v2557_v12, %v942_v44 }
 0x17e   :  { %v535_v53 = vpop.f32.mrf.mxu1  ;;  %v3086_v59 = vpop.eup %2562 }
 0x17f   :  { %v536_v57 = vadd.f32 %v2853_v56, %v535_v53  ;;  %v944_v62 = vmul.f32 %v943_v52, %v3036_v61  ;;  %v975_v4 = vmul.f32 %v3086_v59, %v3068_v36  ;;  %v3130_v37 = vpop.xlane.xlu2 %843 }
 0x180   :  { %vm1017_vm5 = vcmp.eq.f32.partialorder %v3130_v37, inf }
 0x181   :  { %2320 = vmatmul.msk.bf16.gmra.mxu1 %vm442_vm1, %v426_v55  ;;  %v594_v63 = vmax.f32 %v536_v57, 0.0  ;;  %v937_v55 = vsel %vm935_vm6, %v936_v48, %v934_v46  ;;  %v964_v57 = vmul.f32 %v2561_v41, %v963_v49  ;;  %v946_v11 = vsel %vm945_vm7, %v3036_v61, %v944_v62 }
 0x182   :  { %vm1019_vm6 = vcmp.eq.f32.partialorder %v3130_v37, 0.0 }
 0x186   :  { %v537_v60 = vpop.f32.mrf.mxu1 }
 0x187   :  { %v538_v47 = vadd.f32 %v2853_v56, %v537_v60 }
 0x189   :  { %v595_v1 = vmax.f32 %v538_v47, 0.0 }
 0x18b   :  { %v624_v3 = vpack.c.bf16 %v595_v1, %v594_v63  ;;  %v3092_v63 = vpop.xlane.xlu0 %837 }
 0x18c   :  { %2564 = vrsqrt.f32 %v3092_v63  ;;  %vm993_vm15 = vcmp.eq.f32.partialorder %v3092_v63, inf  ;;  %vm995_vm2 = vcmp.eq.f32.partialorder %v3092_v63, 0.0 }
 0x18d   :  { %2336 = vmatmul.msk.bf16.gmra.mxu2 %vm442_vm1, %v624_v3  ;;  %v948_v3 = vand.u32 2147483648, %v3036_v61  ;;  %v2519_v61 = vld [vmem:[%s3938_s2 + $0x10] sm:$0xff]  ;;  %2566 = vrsqrt.f32 %v3106_v15 }
 0x18e   :  { %v540_v7 = vpop.f32.mrf.mxu1  ;;  %2467 = vmatmul.msk.bf16.gmra.mxu0 %vm236_vm0, %v2519_v61  ;;  %2568 = vrsqrt.f32 %v3130_v37 }
 0x18f   :  { %v541_v13 = vadd.f32 %v2853_v56, %v540_v7  ;;  %v965_v7 = vmul.f32 0.5, %v964_v57  ;;  %v949_v27 = vsel %vm947_vm8, %v948_v3, %v946_v11  ;;  %v984_v3 = vand.u32 2147483648, %v3068_v36 }
 0x191   :  { %v596_v22 = vmax.f32 %v541_v13, 0.0  ;;  %v956_v13 = vmul.f32 %v955_v5, %v3042_v8  ;;  %v966_v14 = vsub.f32 1.5, %v965_v7 }
 0x192   :  { %v2565_v54 = vpop.eup %2564 }
 0x193   :  { %v967_v23 = vmul.f32 %v2561_v41, %v966_v14  ;;  %v987_v26 = vmul.f32 %v2565_v54, %v3092_v63  ;;  %v2567_v35 = vpop.eup %2566  ;;  %v3142_v6 = vpop.xlane.xlu0 %846 }
 0x194   :  { %2570 = vrsqrt.f32 %v3142_v6  ;;  %vm1029_vm7 = vcmp.eq.f32.partialorder %v3142_v6, inf  ;;  %vm1031_vm8 = vcmp.eq.f32.partialorder %v3142_v6, 0.0 }
 0x196   :  { %v542_v17 = vpop.f32.mrf.mxu1 }
 0x197   :  { %v543_v19 = vadd.f32 %v2853_v56, %v542_v17  ;;  %v976_v17 = vmul.f32 %v3086_v59, %v975_v4 }
 0x199   :  { %v597_v9 = vmax.f32 %v543_v19, 0.0  ;;  %v977_v16 = vmul.f32 0.5, %v976_v17 }
 0x19b   :  { %v625_v24 = vpack.c.bf16 %v597_v9, %v596_v22  ;;  %v958_v22 = vsel %vm957_vm9, %v3042_v8, %v956_v13  ;;  %v960_v9 = vand.u32 2147483648, %v3042_v8  ;;  %v988_v8 = vmul.f32 %v2565_v54, %v987_v26 }
 0x19d   :  { %2337 = vmatmul.msk.bf16.gmra.mxu2 %vm442_vm1, %v625_v24 }
 0x19e   :  { %v545_v34 = vpop.f32.mrf.mxu1 }
 0x19f   :  { %v546_v51 = vadd.f32 %v2853_v56, %v545_v34  ;;  %v961_v34 = vsel %vm959_vm10, %v960_v9, %v958_v22 }
 0x1a0   :  { %v705_v30 = vpop.f32.mrf.mxu2 }
 0x1a1   :  { %v3071_v43 = vadd.f32 %v3063_v31, %v705_v30  ;;  %v598_v60 = vmax.f32 %v546_v51, 0.0  ;;  %v968_v30 = vmul.f32 %v967_v23, %v3051_v18  ;;  %v999_v51 = vmul.f32 %v2567_v35, %v3106_v15 }
 0x1a3   :  { %v1298_v45 = vadd.f32 %v925_v38, %v3071_v43  ;;  %v978_v38 = vsub.f32 1.5, %v977_v16  ;;  %v970_v49 = vsel %vm969_vm11, %v3051_v18, %v968_v30  ;;  %v1000_v57 = vmul.f32 %v2567_v35, %v999_v51  ;;  %v2520_v18 = vld [vmem:[%s3938_s2 + $0x18] sm:$0xff]  ;;  %v3165_v16 = vpop.xlane.xlu1 %849 }
 0x1a4   :  { %2468 = vmatmul.msk.bf16.gmra.mxu0 %vm236_vm0, %v2520_v18  ;;  %2572 = vrsqrt.f32 %v3165_v16  ;;  %vm1041_vm9 = vcmp.eq.f32.partialorder %v3165_v16, inf  ;;  %vm1043_vm10 = vcmp.eq.f32.partialorder %v3165_v16, 0.0 }
 0x1a5   :  { %v2345_v29 = vadd.f32 -1.0, %v1298_v45  ;;  %v979_v52 = vmul.f32 %v3086_v59, %v978_v38  ;;  %v1001_v4 = vmul.f32 0.5, %v1000_v57 }
 0x1a6   :  { %v547_v21 = vpop.f32.mrf.mxu1 }
 0x1a7   :  { %v548_v40 = vadd.f32 %v2853_v56, %v547_v21  ;;  %1986 = vperm.xlu2 %2544, %v2345_v29   ;;  %v989_v21 = vmul.f32 0.5, %v988_v8  ;;  %v980_v62 = vmul.f32 %v979_v52, %v3068_v36  ;;  %v1002_v14 = vsub.f32 1.5, %v1001_v4 }
 0x1a8   :  { %v707_v53 = vpop.f32.mrf.mxu2 }
 0x1a9   :  { %v599_v42 = vmax.f32 %v548_v40, 0.0  ;;  %v3089_v47 = vadd.f32 %v3063_v31, %v707_v53 }
 0x1ab   :  { %v626_v0 = vpack.c.bf16 %v599_v42, %v598_v60  ;;  %v1299_v1 = vadd.f32 %v937_v55, %v3089_v47  ;;  %v1367_v2 = vpack.c.bf16 %v3089_v47, %v3071_v43  ;;  %v973_v55 = vsel %vm971_vm12, %v972_v50, %v970_v49  ;;  %v2569_v60 = vpop.eup %2568  ;;  %v3185_v50 = vpop.xlane.xlu2 %852 }
 0x1ac   :  { %v2571_v61 = vpop.eup %2570  ;;  %2574 = vrsqrt.f32 %v3185_v50  ;;  %vm1053_vm11 = vcmp.eq.f32.partialorder %v3185_v50, inf  ;;  %vm1055_vm12 = vcmp.eq.f32.partialorder %v3185_v50, 0.0 }
 0x1ad   :  { %2338 = vmatmul.msk.bf16.gmra.mxu2 %vm442_vm1, %v626_v0  ;;  %v2346_v10 = vadd.f32 -1.0, %v1299_v1  ;;  %v990_v0 = vsub.f32 1.5, %v989_v21  ;;  %v1011_v1 = vmul.f32 %v2569_v60, %v3130_v37  ;;  %v1023_v26 = vmul.f32 %v2571_v61, %v3142_v6  ;;  %v2573_v49 = vpop.eup %2572 }
 0x1ae   :  { %v550_v20 = vpop.f32.mrf.mxu1 }
 0x1af   :  { %1991 = vperm.xlu0 %2545, %v2346_v10   ;;  %v551_v24 = vadd.f32 %v2853_v56, %v550_v20  ;;  %v982_v10 = vsel %vm981_vm13, %v3068_v36, %v980_v62  ;;  %v991_v11 = vmul.f32 %v2565_v54, %v990_v0  ;;  %v1012_v17 = vmul.f32 %v2569_v60, %v1011_v1 }
 0x1b0   :  { %v710_v12 = vpop.f32.mrf.mxu2  ;;  %v985_v13 = vsel %vm983_vm14, %v984_v3, %v982_v10 }
 0x1b1   :  { %v3110_v19 = vadd.f32 %v3063_v31, %v710_v12  ;;  %v600_v39 = vmax.f32 %v551_v24, 0.0  ;;  %v992_v23 = vmul.f32 %v991_v11, %v3092_v63 }
 0x1b2   :  { %v2575_v3 = vpop.eup %2574 }
 0x1b3   :  { %v1300_v58 = vadd.f32 %v949_v27, %v3110_v19 }
 0x1b5   :  { %v2347_v25 = vadd.f32 -1.0, %v1300_v58 }
 0x1b6   :  { %v552_v28 = vpop.f32.mrf.mxu1 }
 0x1b7   :  { %v553_v32 = vadd.f32 %v2853_v56, %v552_v28  ;;  %1996 = vperm.xlu1 %2546, %v2347_v25   ;;  %v996_v25 = vand.u32 2147483648, %v3092_v63  ;;  %v1003_v28 = vmul.f32 %v2567_v35, %v1002_v14 }
 0x1b8   :  { %v712_v33 = vpop.f32.mrf.mxu2 }
 0x1b9   :  { %v601_v41 = vmax.f32 %v553_v32, 0.0  ;;  %v3128_v44 = vadd.f32 %v3063_v31, %v712_v33  ;;  %v1013_v32 = vmul.f32 0.5, %v1012_v17 }
 0x1bb   :  { %v627_v45 = vpack.c.bf16 %v601_v41, %v600_v39  ;;  %v1301_v46 = vadd.f32 %v961_v34, %v3128_v44  ;;  %v1368_v48 = vpack.c.bf16 %v3128_v44, %v3110_v19  ;;  %v994_v34 = vsel %vm993_vm15, %v3092_v63, %v992_v23 }
 0x1bc   :  { %v997_v39 = vsel %vm995_vm2, %v996_v25, %v994_v34  ;;  %v1004_v41 = vmul.f32 %v1003_v28, %v3106_v15  ;;  %v1014_v8 = vsub.f32 1.5, %v1013_v32  ;;  %v2522_v32 = vld [vmem:[%s3938_s2 + $0x28] sm:$0xff]  ;;  %v3222_v34 = vpop.xlane.xlu1 %858 }
 0x1bd   :  { %2339 = vmatmul.msk.bf16.gmra.mxu2 %vm442_vm1, %v627_v45  ;;  %v2348_v29 = vadd.f32 -1.0, %v1301_v46  ;;  %v1024_v45 = vmul.f32 %v2571_v61, %v1023_v26  ;;  %v2521_v46 = vld [vmem:[%s3938_s2 + $0x20] sm:$0xff]  ;;  %vm1077_vm15 = vcmp.eq.f32.partialorder %v3222_v34, inf  ;;  %vm1079_vm2 = vcmp.eq.f32.partialorder %v3222_v34, 0.0 }
 0x1be   :  { %v555_v40 = vpop.f32.mrf.mxu1  ;;  %2469 = vmatmul.msk.bf16.gmra.mxu0 %vm236_vm0, %v2521_v46  ;;  %v1006_v51 = vsel %vm1005_vm3, %v3106_v15, %v1004_v41  ;;  %v1015_v52 = vmul.f32 %v2569_v60, %v1014_v8 }
 0x1bf   :  { %2001 = vperm.xlu2 %2544, %v2348_v29   ;;  %v556_v5 = vadd.f32 %v2853_v56, %v555_v40  ;;  %v1008_v29 = vand.u32 2147483648, %v3106_v15  ;;  %v1025_v21 = vmul.f32 0.5, %v1024_v45  ;;  %v3201_v15 = vpop.xlane.xlu0 %855 }
 0x1c0   :  { %v715_v53 = vpop.f32.mrf.mxu2  ;;  %2576 = vrsqrt.f32 %v3201_v15  ;;  %vm1065_vm13 = vcmp.eq.f32.partialorder %v3201_v15, inf  ;;  %vm1067_vm14 = vcmp.eq.f32.partialorder %v3201_v15, 0.0 }
 0x1c1   :  { %v3145_v42 = vadd.f32 %v3063_v31, %v715_v53  ;;  %v602_v58 = vmax.f32 %v556_v5, 0.0  ;;  %v1009_v18 = vsel %vm1007_vm4, %v1008_v29, %v1006_v51  ;;  %v1026_v1 = vsub.f32 1.5, %v1025_v21 }
 0x1c2   :  { %2578 = vrsqrt.f32 %v3222_v34 }
 0x1c3   :  { %v1302_v59 = vadd.f32 %v973_v55, %v3145_v42  ;;  %v1035_v55 = vmul.f32 %v2573_v49, %v3165_v16 }
 0x1c5   :  { %v2349_v7 = vadd.f32 -1.0, %v1302_v59  ;;  %v1016_v59 = vmul.f32 %v1015_v52, %v3130_v37 }
 0x1c6   :  { %v557_v20 = vpop.f32.mrf.mxu1  ;;  %v2577_v26 = vpop.eup %2576 }
 0x1c7   :  { %v558_v12 = vadd.f32 %v2853_v56, %v557_v20  ;;  %2006 = vperm.xlu2 %2544, %v2349_v7   ;;  %v1036_v7 = vmul.f32 %v2573_v49, %v1035_v55  ;;  %v1018_v17 = vsel %vm1017_vm5, %v3130_v37, %v1016_v59 }
 0x1c8   :  { %v717_v27 = vpop.f32.mrf.mxu2 }
 0x1c9   :  { %v603_v22 = vmax.f32 %v558_v12, 0.0  ;;  %v3162_v9 = vadd.f32 %v3063_v31, %v717_v27  ;;  %v1047_v12 = vmul.f32 %v2575_v3, %v3185_v50  ;;  %v1020_v27 = vand.u32 2147483648, %v3130_v37 }
 0x1cb   :  { %v628_v36 = vpack.c.bf16 %v603_v22, %v602_v58  ;;  %v1303_v54 = vadd.f32 %v985_v13, %v3162_v9  ;;  %v1369_v24 = vpack.c.bf16 %v3162_v9, %v3145_v42  ;;  %v1027_v13 = vmul.f32 %v2571_v61, %v1026_v1 }
 0x1cc   :  { %v1037_v58 = vmul.f32 0.5, %v1036_v7  ;;  %v1048_v25 = vmul.f32 %v2575_v3, %v1047_v12 }
 0x1cd   :  { %2340 = vmatmul.msk.bf16.gmra.mxu2 %vm442_vm1, %v628_v36  ;;  %v2350_v33 = vadd.f32 -1.0, %v1303_v54  ;;  %v1021_v36 = vsel %vm1019_vm6, %v1020_v27, %v1018_v17  ;;  %v1028_v54 = vmul.f32 %v1027_v13, %v3142_v6 }
 0x1ce   :  { %v560_v30 = vpop.f32.mrf.mxu1  ;;  %v1038_v61 = vsub.f32 1.5, %v1037_v58  ;;  %2470 = vmatmul.msk.bf16.gmra.mxu0 %vm236_vm0, %v2522_v32  ;;  %v3259_v58 = vpop.xlane.xlu0 %864 }
 0x1cf   :  { %2011 = vperm.xlu1 %2546, %v2350_v33   ;;  %v561_v40 = vadd.f32 %v2853_v56, %v560_v30  ;;  %v1032_v33 = vand.u32 2147483648, %v3142_v6  ;;  %v1030_v30 = vsel %vm1029_vm7, %v3142_v6, %v1028_v54  ;;  %v1056_v54 = vand.u32 2147483648, %v3185_v50 }
 0x1d0   :  { %v720_v38 = vpop.f32.mrf.mxu2  ;;  %v1039_v45 = vmul.f32 %v2573_v49, %v1038_v61  ;;  %v2616_v61 = vld [vmem:[%s3932_s6] ss:$0 sm:$0xff]  ;;  %vm1103_vm5 = vcmp.eq.f32.partialorder %v3259_v58, 0.0 }
 0x1d1   :  { %v3179_v35 = vadd.f32 %v3063_v31, %v720_v38  ;;  %v604_v4 = vmax.f32 %v561_v40, 0.0  ;;  %v1059_v38 = vmul.f32 %v2577_v26, %v3201_v15  ;;  %v1033_v29 = vsel %vm1031_vm8, %v1032_v33, %v1030_v30 }
 0x1d3   :  { %v1304_v63 = vadd.f32 %v997_v39, %v3179_v35  ;;  %v1049_v39 = vmul.f32 0.5, %v1048_v25  ;;  %v1060_v21 = vmul.f32 %v2577_v26, %v1059_v38 }
 0x1d5   :  { %v2351_v53 = vadd.f32 -1.0, %v1304_v63  ;;  %v1050_v52 = vsub.f32 1.5, %v1049_v39  ;;  %v1061_v1 = vmul.f32 0.5, %v1060_v21 }
 0x1d6   :  { %v562_v57 = vpop.f32.mrf.mxu1 }
 0x1d7   :  { %v563_v62 = vadd.f32 %v2853_v56, %v562_v57  ;;  %2016 = vperm.xlu2 %2544, %v2351_v53   ;;  %v1040_v57 = vmul.f32 %v1039_v45, %v3165_v16  ;;  %v1051_v59 = vmul.f32 %v2575_v3, %v1050_v52  ;;  %v1062_v13 = vsub.f32 1.5, %v1061_v1  ;;  %v3277_v52 = vpop.xlane.xlu1 %867 }
 0x1d8   :  { %v722_v0 = vpop.f32.mrf.mxu2  ;;  %vm1113_vm6 = vcmp.eq.f32.partialorder %v3277_v52, inf  ;;  %vm1115_vm7 = vcmp.eq.f32.partialorder %v3277_v52, 0.0 }
 0x1d9   :  { %v605_v60 = vmax.f32 %v563_v62, 0.0  ;;  %v3198_v5 = vadd.f32 %v3063_v31, %v722_v0  ;;  %v3235_v62 = vpop.eup %2578  ;;  %v3237_v0 = vpop.xlane.xlu2 %861  ;;  %v1052_v27 = vmul.f32 %v1051_v59, %v3185_v50  ;;  %v1063_v25 = vmul.f32 %v2577_v26, %v1062_v13 }
 0x1da   :  { %2580 = vrsqrt.f32 %v3237_v0  ;;  %v1071_v7 = vmul.f32 %v3235_v62, %v3222_v34  ;;  %vm1089_vm3 = vcmp.eq.f32.partialorder %v3237_v0, inf  ;;  %vm1091_vm4 = vcmp.eq.f32.partialorder %v3237_v0, 0.0 }
 0x1db   :  { %v629_v10 = vpack.c.bf16 %v605_v60, %v604_v4  ;;  %v1305_v11 = vadd.f32 %v1009_v18, %v3198_v5  ;;  %v1370_v20 = vpack.c.bf16 %v3198_v5, %v3179_v35  ;;  %v1044_v18 = vand.u32 2147483648, %v3165_v16 }
 0x1dc   :  { %v1042_v60 = vsel %vm1041_vm9, %v3165_v16, %v1040_v57  ;;  %v1072_v17 = vmul.f32 %v3235_v62, %v1071_v7  ;;  %v2523_v16 = vld [vmem:[%s3938_s2 + $0x30] sm:$0xff]  ;;  %2582 = vrsqrt.f32 %v3259_v58  ;;  %v1068_v57 = vand.u32 2147483648, %v3201_v15 }
 0x1dd   :  { %2341 = vmatmul.msk.bf16.gmra.mxu2 %vm442_vm1, %v629_v10  ;;  %v2352_v14 = vadd.f32 -1.0, %v1305_v11  ;;  %v1045_v12 = vsel %vm1043_vm10, %v1044_v18, %v1042_v60  ;;  %2584 = vrsqrt.f32 %v3277_v52 }
 0x1de   :  { %v565_v22 = vpop.f32.mrf.mxu1  ;;  %2471 = vmatmul.msk.bf16.gmra.mxu0 %vm236_vm0, %v2523_v16  ;;  %v1073_v33 = vmul.f32 0.5, %v1072_v17  ;;  %v1080_v16 = vand.u32 2147483648, %v3222_v34 }
 0x1df   :  { %2021 = vperm.xlu1 %2546, %v2352_v14   ;;  %v566_v41 = vadd.f32 %v2853_v56, %v565_v22 }
 0x1e0   :  { %v725_v23 = vpop.f32.mrf.mxu2  ;;  %v2581_v14 = vpop.eup %2580 }
 0x1e1   :  { %v3214_v28 = vadd.f32 %v3063_v31, %v725_v23  ;;  %v606_v40 = vmax.f32 %v566_v41, 0.0  ;;  %v1083_v23 = vmul.f32 %v2581_v14, %v3237_v0  ;;  %v3301_v13 = vpop.xlane.xlu2 %870 }
 0x1e2   :  { %2586 = vrsqrt.f32 %v3301_v13  ;;  %vm1125_vm8 = vcmp.eq.f32.partialorder %v3301_v13, inf  ;;  %vm1127_vm9 = vcmp.eq.f32.partialorder %v3301_v13, 0.0 }
 0x1e3   :  { %v1306_v37 = vadd.f32 %v1021_v36, %v3214_v28  ;;  %v1054_v36 = vsel %vm1053_vm11, %v3185_v50, %v1052_v27  ;;  %v1084_v45 = vmul.f32 %v2581_v14, %v1083_v23 }
 0x1e4   :  { %v1057_v41 = vsel %vm1055_vm12, %v1056_v54, %v1054_v36 }
 0x1e5   :  { %v2353_v8 = vadd.f32 -1.0, %v1306_v37 }
 0x1e6   :  { %v567_v46 = vpop.f32.mrf.mxu1 }
 0x1e7   :  { %v568_v63 = vadd.f32 %v2853_v56, %v567_v46  ;;  %2026 = vperm.xlu0 %2545, %v2353_v8   ;;  %v1064_v8 = vmul.f32 %v1063_v25, %v3201_v15  ;;  %v3272_v46 = vpop.eup %2582 }
 0x1e8   :  { %v727_v51 = vpop.f32.mrf.mxu2 }
 0x1e9   :  { %v607_v53 = vmax.f32 %v568_v63, 0.0  ;;  %v3232_v55 = vadd.f32 %v3063_v31, %v727_v51  ;;  %v1066_v18 = vsel %vm1065_vm13, %v3201_v15, %v1064_v8  ;;  %v2524_v15 = vld [vmem:[%s3938_s2 + $0x38] sm:$0xff] }
 0x1ea   :  { %v1069_v60 = vsel %vm1067_vm14, %v1068_v57, %v1066_v18 }
 0x1eb   :  { %v630_v56 = vpack.c.bf16 %v607_v53, %v606_v40  ;;  %v1307_v6 = vadd.f32 %v1033_v29, %v3232_v55  ;;  %v1371_v49 = vpack.c.bf16 %v3232_v55, %v3214_v28  ;;  %v1074_v29 = vsub.f32 1.5, %v1073_v33 }
 0x1ec   :  { %v1095_v53 = vmul.f32 %v3272_v46, %v3259_v58 }
 0x1ed   :  { %2342 = vmatmul.msk.bf16.gmra.mxu2 %vm442_vm1, %v630_v56  ;;  %v2354_v4 = vadd.f32 -1.0, %v1307_v6  ;;  %v1085_v56 = vmul.f32 0.5, %v1084_v45  ;;  %v1075_v59 = vmul.f32 %v3235_v62, %v1074_v29 }
 0x1ee   :  { %v570_v10 = vpop.f32.mrf.mxu1  ;;  %2472 = vmatmul.msk.bf16.gmra.mxu0 %vm236_vm0, %v2524_v15 }
 0x1ef   :  { %2031 = vperm.xlu2 %2544, %v2354_v4   ;;  %v571_v32 = vadd.f32 %v2616_v61, %v570_v10  ;;  %v1086_v7 = vsub.f32 1.5, %v1085_v56  ;;  %v1096_v10 = vmul.f32 %v3272_v46, %v1095_v53  ;;  %v1076_v27 = vmul.f32 %v1075_v59, %v3222_v34 }
 0x1f0   :  { %v730_v11 = vpop.f32.mrf.mxu2  ;;  %v1092_v53 = vand.u32 2147483648, %v3237_v0 }
 0x1f1   :  { %v3252_v3 = vadd.f32 %v3063_v31, %v730_v11  ;;  %v608_v26 = vmax.f32 %v571_v32, 0.0  ;;  %v3292_v11 = vpop.eup %2584  ;;  %v1097_v23 = vmul.f32 0.5, %v1096_v10  ;;  %v1078_v25 = vsel %vm1077_vm15, %v3222_v34, %v1076_v27  ;;  %v2540_v32 = vld [vmem:[%s3939_s12] sm:$0xff] }
 0x1f2   :  { %v1107_v17 = vmul.f32 %v3292_v11, %v3277_v52  ;;  %1899 = vmatpush.bf16.msrb.mxu3 %v2540_v32 }
 0x1f3   :  { %v1308_v22 = vadd.f32 %v1045_v12, %v3252_v3 }
 0x1f4   :  { %v1108_v34 = vmul.f32 %v3292_v11, %v1107_v17 }
 0x1f5   :  { %v2355_v37 = vadd.f32 -1.0, %v1308_v22  ;;  %v1087_v22 = vmul.f32 %v2581_v14, %v1086_v7  ;;  %v1098_v14 = vsub.f32 1.5, %v1097_v23 }
 0x1f6   :  { %v572_v30 = vpop.f32.mrf.mxu1  ;;  %v1109_v18 = vmul.f32 0.5, %v1108_v34  ;;  %v1116_v34 = vand.u32 2147483648, %v3277_v52 }
 0x1f7   :  { %v573_v38 = vadd.f32 %v2616_v61, %v572_v30  ;;  %2036 = vperm.xlu1 %2546, %v2355_v37  }
 0x1f8   :  { %v732_v39 = vpop.f32.mrf.mxu2  ;;  %v1110_v15 = vsub.f32 1.5, %v1109_v18 }
 0x1f9   :  { %v609_v63 = vmax.f32 %v573_v38, 0.0  ;;  %v3275_v51 = vadd.f32 %v3063_v31, %v732_v39  ;;  %v1081_v38 = vsel %vm1079_vm2, %v1080_v16, %v1078_v25  ;;  %v1088_v39 = vmul.f32 %v1087_v22, %v3237_v0 }
 0x1fa   :  { %v1104_v16 = vand.u32 2147483648, %v3259_v58 }
 0x1fb   :  { %v631_v50 = vpack.c.bf16 %v609_v63, %v608_v26  ;;  %v1309_v21 = vadd.f32 %v1057_v41, %v3275_v51  ;;  %v1372_v40 = vpack.c.bf16 %v3275_v51, %v3252_v3  ;;  %v2587_v41 = vpop.eup %2586  ;;  %v3320_v63 = vpop.xlane.xlu0 %873  ;;  %v1090_v56 = vsel %vm1089_vm3, %v3237_v0, %v1088_v39  ;;  %v2531_v51 = vld [vmem:[%s3938_s2 + $0x70] sm:$0xff] }
 0x1fc   :  { %2588 = vrsqrt.f32 %v3320_v63  ;;  %v3340_v0 = vpop.xlane.xlu1 %876  ;;  %vm1137_vm10 = vcmp.eq.f32.partialorder %v3320_v63, inf  ;;  %vm1139_vm11 = vcmp.eq.f32.partialorder %v3320_v63, 0.0 }
 0x1fd   :  { %2343 = vmatmul.msk.bf16.gmra.mxu2 %vm442_vm1, %v631_v50  ;;  %v2356_v6 = vadd.f32 -1.0, %v1309_v21  ;;  %v1119_v21 = vmul.f32 %v2587_v41, %v3301_v13  ;;  %2590 = vrsqrt.f32 %v3340_v0  ;;  %vm1149_vm12 = vcmp.eq.f32.partialorder %v3340_v0, inf }
 0x1fe   :  { %v575_v1 = vpop.f32.mrf.mxu1  ;;  %vm1151_vm13 = vcmp.eq.f32.partialorder %v3340_v0, 0.0 }
 0x1ff   :  { %2041 = vperm.xlu0 %2545, %v2356_v6   ;;  %v576_v36 = vadd.f32 %v2616_v61, %v575_v1  ;;  %v1099_v6 = vmul.f32 %v3272_v46, %v1098_v14  ;;  %v1093_v1 = vsel %vm1091_vm4, %v1092_v53, %v1090_v56 }
 0x200   :  { %v735_v4 = vpop.f32.mrf.mxu2 }
 0x201   :  { %v3295_v12 = vadd.f32 %v3063_v31, %v735_v4  ;;  %v610_v8 = vmax.f32 %v576_v36, 0.0  ;;  %v1120_v4 = vmul.f32 %v2587_v41, %v1119_v21  ;;  %v1100_v27 = vmul.f32 %v1099_v6, %v3259_v58 }
 0x202   :  { %v2589_v7 = vpop.eup %2588 }
 0x203   :  { %v1310_v62 = vadd.f32 %v1069_v60, %v3295_v12  ;;  %v3333_v60 = vpop.f32.mrf.mxu0  ;;  %v1131_v17 = vmul.f32 %v2589_v7, %v3320_v63  ;;  %v1121_v22 = vmul.f32 0.5, %v1120_v4 }
 0x205   :  { %v2357_v54 = vadd.f32 -1.0, %v1310_v62  ;;  %v2525_v62 = vld [vmem:[%s3938_s2 + $0x40] sm:$0xff]  ;;  %v1132_v14 = vmul.f32 %v2589_v7, %v1131_v17 }
 0x206   :  { %v577_v37 = vpop.f32.mrf.mxu1  ;;  %2473 = vmatmul.msk.bf16.gmra.mxu0 %vm236_vm0, %v2525_v62 }
 0x207   :  { %v578_v33 = vadd.f32 %v2616_v61, %v577_v37  ;;  %2046 = vperm.xlu2 %2544, %v2357_v54   ;;  %v1111_v54 = vmul.f32 %v3292_v11, %v1110_v15  ;;  %v1122_v37 = vsub.f32 1.5, %v1121_v22  ;;  %v1133_v53 = vmul.f32 0.5, %v1132_v14 }
 0x208   :  { %v737_v30 = vpop.f32.mrf.mxu2 }
 0x209   :  { %v611_v45 = vmax.f32 %v578_v33, 0.0  ;;  %v3317_v26 = vadd.f32 %v3063_v31, %v737_v30  ;;  %v3352_v30 = vpop.eup %2590  ;;  %v1112_v39 = vmul.f32 %v1111_v54, %v3277_v52  ;;  %v1134_v47 = vsub.f32 1.5, %v1133_v53 }
 0x20b   :  { %v632_v61 = vpack.c.bf16 %v611_v45, %v610_v8  ;;  %v1311_v29 = vadd.f32 %v1081_v38, %v3317_v26  ;;  %v1373_v50 = vpack.c.bf16 %v3317_v26, %v3295_v12  ;;  %v3350_v33 = vpop.f32.mrf.mxu0  ;;  %v3356_v8 = vpop.xlane.xlu2 %879  ;;  %v1143_v45 = vmul.f32 %v3352_v30, %v3340_v0 }
 0x20c   :  { %2592 = vrsqrt.f32 %v3356_v8  ;;  %v1114_v21 = vsel %vm1113_vm6, %v3277_v52, %v1112_v39  ;;  %v2526_v52 = vld [vmem:[%s3938_s2 + $0x48] sm:$0xff]  ;;  %v1135_v62 = vmul.f32 %v2589_v7, %v1134_v47  ;;  %v1140_v39 = vand.u32 2147483648, %v3320_v63 }
 0x20d   :  { %2344 = vmatmul.msk.bf16.gmra.mxu2 %vm442_vm1, %v632_v61  ;;  %v2358_v57 = vadd.f32 -1.0, %v1311_v29  ;;  %vm1101_vm1 = vcmp.eq.f32.partialorder %v3259_v58, inf  ;;  %v1123_v61 = vmul.f32 %v2587_v41, %v1122_v37  ;;  %v1117_v56 = vsel %vm1115_vm7, %v1116_v34, %v1114_v21  ;;  %v3391_v37 = vpop.xlane.xlu1 %885 }
 0x20e   :  { %v1102_v36 = vsel %vm1101_vm1, %v3259_v58, %v1100_v27  ;;  %v1128_v27 = vand.u32 2147483648, %v3301_v13  ;;  %vm1161_vm14 = vcmp.eq.f32.partialorder %v3356_v8, inf  ;;  %vm1163_vm15 = vcmp.eq.f32.partialorder %v3356_v8, 0.0 }
 0x20f   :  { %2051 = vperm.xlu1 %2546, %v2358_v57   ;;  %v1105_v32 = vsel %vm1103_vm5, %v1104_v16, %v1102_v36  ;;  %v1124_v6 = vmul.f32 %v1123_v61, %v3301_v13  ;;  %vm1185_vm4 = vcmp.eq.f32.partialorder %v3391_v37, inf  ;;  %vm1187_vm1 = vcmp.eq.f32.partialorder %v3391_v37, 0.0 }
 0x210   :  { %v740_v59 = vpop.f32.mrf.mxu2 }
 0x211   :  { %v741_v10 = vadd.f32 %v3063_v31, %v740_v59  ;;  %v3379_v59 = vpop.xlane.xlu0 %882 }
 0x212   :  { %v2593_v41 = vpop.eup %2592  ;;  %2594 = vrsqrt.f32 %v3379_v59  ;;  %vm1173_vm2 = vcmp.eq.f32.partialorder %v3379_v59, inf  ;;  %vm1175_vm3 = vcmp.eq.f32.partialorder %v3379_v59, 0.0 }
 0x213   :  { %v1312_v46 = vadd.f32 %v1093_v1, %v741_v10  ;;  %v3371_v18 = vpop.f32.mrf.mxu0  ;;  %v1155_v4 = vmul.f32 %v2593_v41, %v3356_v8  ;;  %2596 = vrsqrt.f32 %v3391_v37 }
 0x215   :  { %v2359_v23 = vadd.f32 -1.0, %v1312_v46  ;;  %v1156_v22 = vmul.f32 %v2593_v41, %v1155_v4 }
 0x216   :  { %2474 = vmatmul.msk.bf16.gmra.mxu0 %vm236_vm0, %v2526_v52 }
 0x217   :  { %2056 = vperm.xlu0 %2545, %v2359_v23   ;;  %v1157_v14 = vmul.f32 0.5, %v1156_v22 }
 0x218   :  { %v742_v25 = vpop.f32.mrf.mxu2  ;;  %v2595_v36 = vpop.eup %2594 }
 0x219   :  { %v743_v38 = vadd.f32 %v3063_v31, %v742_v25  ;;  %v1136_v25 = vmul.f32 %v1135_v62, %v3320_v63  ;;  %v2597_v53 = vpop.eup %2596 }
 0x21b   :  { %v1313_v58 = vadd.f32 %v1105_v32, %v743_v38  ;;  %v1374_v11 = vpack.c.bf16 %v743_v38, %v741_v10  ;;  %v1126_v10 = vsel %vm1125_vm8, %v3301_v13, %v1124_v6  ;;  %v3387_v23 = vpop.f32.mrf.mxu0  ;;  %v1167_v38 = vmul.f32 %v2595_v36, %v3379_v59 }
 0x21c   :  { %v1129_v16 = vsel %vm1127_vm9, %v1128_v27, %v1126_v10  ;;  %v1152_v6 = vand.u32 2147483648, %v3340_v0 }
 0x21d   :  { %2381 = vmatmul.msk.bf16.vlgmr.msrb.gmra.mxu2 %vm236_vm0, %v1367_v2  ;;  %2388 = vmatmul.msk.bf16.vlgmr.msra.gmra.mxu3 %vm236_vm0, %v1374_v11  ;;  %v2360_v29 = vadd.f32 -1.0, %v1313_v58  ;;  %v1144_v2 = vmul.f32 %v3352_v30, %v1143_v45  ;;  %v1138_v11 = vsel %vm1137_vm10, %v3320_v63, %v1136_v25  ;;  %v1164_v25 = vand.u32 2147483648, %v3356_v8 }
 0x21e   :  { %v1141_v61 = vsel %vm1139_vm11, %v1140_v39, %v1138_v11 }
 0x21f   :  { %2061 = vperm.xlu2 %2544, %v2360_v29   ;;  %v1145_v46 = vmul.f32 0.5, %v1144_v2  ;;  %v1158_v29 = vsub.f32 1.5, %v1157_v14 }
 0x220   :  { %v745_v57 = vpop.f32.mrf.mxu2 }
 0x221   :  { %v746_v43 = vadd.f32 %v3063_v31, %v745_v57  ;;  %v1146_v32 = vsub.f32 1.5, %v1145_v46  ;;  %v2527_v57 = vld [vmem:[%s3938_s2 + $0x50] sm:$0xff] }
 0x223   :  { %v1314_v1 = vadd.f32 %v1117_v56, %v746_v43  ;;  %v1147_v45 = vmul.f32 %v3352_v30, %v1146_v32  ;;  %v3405_v21 = vpop.f32.mrf.mxu0  ;;  %v3412_v56 = vpop.xlane.xlu2 %888  ;;  %v1179_v30 = vmul.f32 %v2597_v53, %v3391_v37 }
 0x224   :  { %2598 = vrsqrt.f32 %v3412_v56  ;;  %vm1197_vm5 = vcmp.eq.f32.partialorder %v3412_v56, inf  ;;  %vm1199_vm6 = vcmp.eq.f32.partialorder %v3412_v56, 0.0 }
 0x225   :  { %v2361_v15 = vadd.f32 -1.0, %v1314_v1  ;;  %v1148_v44 = vmul.f32 %v1147_v45, %v3340_v0 }
 0x226   :  { %2475 = vmatmul.msk.bf16.gmra.mxu0 %vm236_vm0, %v2527_v57 }
 0x227   :  { %2066 = vperm.xlu1 %2546, %v2361_v15   ;;  %v1150_v2 = vsel %vm1149_vm12, %v3340_v0, %v1148_v44 }
 0x228   :  { %v747_v17 = vpop.f32.mrf.mxu2  ;;  %v1153_v4 = vsel %vm1151_vm13, %v1152_v6, %v1150_v2 }
 0x229   :  { %v748_v54 = vadd.f32 %v3063_v31, %v747_v17  ;;  %v3426_v17 = vpop.xlane.xlu0 %891 }
 0x22a   :  { %v2599_v15 = vpop.eup %2598  ;;  %2600 = vrsqrt.f32 %v3426_v17  ;;  %vm1209_vm7 = vcmp.eq.f32.partialorder %v3426_v17, inf  ;;  %vm1211_vm8 = vcmp.eq.f32.partialorder %v3426_v17, 0.0 }
 0x22b   :  { %v1315_v13 = vadd.f32 %v1129_v16, %v748_v54  ;;  %v1375_v7 = vpack.c.bf16 %v748_v54, %v746_v43  ;;  %v1159_v43 = vmul.f32 %v2593_v41, %v1158_v29  ;;  %v3422_v27 = vpop.f32.mrf.mxu0  ;;  %v1180_v41 = vmul.f32 %v2597_v53, %v1179_v30 }
 0x22c   :  { %v1191_v22 = vmul.f32 %v2599_v15, %v3412_v56 }
 0x22d   :  { %2382 = vmatmul.msk.bf16.gmra.mxu2 %vm236_vm0, %v1368_v48  ;;  %2389 = vmatmul.msk.bf16.gmra.mxu3 %vm236_vm0, %v1375_v7  ;;  %v2362_v58 = vadd.f32 -1.0, %v1315_v13  ;;  %v1168_v48 = vmul.f32 %v2595_v36, %v1167_v38  ;;  %v1160_v10 = vmul.f32 %v1159_v43, %v3356_v8  ;;  %v1181_v7 = vmul.f32 0.5, %v1180_v41  ;;  %v3461_v43 = vld [vmem:[%s3936_s8] ss:$0 sm:$0xff] }
 0x22e   :  { %v1192_v14 = vmul.f32 %v2599_v15, %v1191_v22 }
 0x22f   :  { %2071 = vperm.xlu0 %2545, %v2362_v58   ;;  %v1169_v52 = vmul.f32 0.5, %v1168_v48  ;;  %v1162_v54 = vsel %vm1161_vm14, %v3356_v8, %v1160_v10  ;;  %v1182_v9 = vsub.f32 1.5, %v1181_v7  ;;  %v1188_v10 = vand.u32 2147483648, %v3391_v37 }
 0x230   :  { %v750_v34 = vpop.f32.mrf.mxu2  ;;  %v1165_v39 = vsel %vm1163_vm15, %v1164_v25, %v1162_v54  ;;  %v2601_v11 = vpop.eup %2600 }
 0x231   :  { %v751_v19 = vadd.f32 %v3063_v31, %v750_v34  ;;  %v1170_v46 = vsub.f32 1.5, %v1169_v52  ;;  %v3445_v34 = vpop.xlane.xlu1 %894  ;;  %v1183_v44 = vmul.f32 %v2597_v53, %v1182_v9 }
 0x232   :  { %2602 = vrsqrt.f32 %v3445_v34  ;;  %vm1221_vm9 = vcmp.eq.f32.partialorder %v3445_v34, inf  ;;  %vm1223_vm10 = vcmp.eq.f32.partialorder %v3445_v34, 0.0 }
 0x233   :  { %v1316_v63 = vadd.f32 %v1141_v61, %v751_v19  ;;  %v1171_v13 = vmul.f32 %v2595_v36, %v1170_v46  ;;  %v3438_v58 = vpop.f32.mrf.mxu0  ;;  %v1203_v36 = vmul.f32 %v2601_v11, %v3426_v17  ;;  %v1193_v61 = vmul.f32 0.5, %v1192_v14 }
 0x234   :  { %v1184_v2 = vmul.f32 %v1183_v44, %v3391_v37 }
 0x235   :  { %v2363_v47 = vadd.f32 -1.0, %v1316_v63  ;;  %v1172_v42 = vmul.f32 %v1171_v13, %v3379_v59  ;;  %v1194_v63 = vsub.f32 1.5, %v1193_v61  ;;  %v1204_v52 = vmul.f32 %v2601_v11, %v1203_v36 }
 0x236   :  { %v1186_v41 = vsel %vm1185_vm4, %v3391_v37, %v1184_v2  ;;  %v2529_v37 = vld [vmem:[%s3938_s2 + $0x60] sm:$0xff] }
 0x237   :  { %2076 = vperm.xlu2 %2544, %v2363_v47   ;;  %v1189_v22 = vsel %vm1187_vm1, %v1188_v10, %v1186_v41 }
 0x238   :  { %v752_v1 = vpop.f32.mrf.mxu2  ;;  %v3456_v6 = vpop.eup %2602 }
 0x239   :  { %v753_v62 = vadd.f32 %v3063_v31, %v752_v1  ;;  %v3500_v44 = vpop.xlane.xlu1 %903 }
 0x23a   :  { %vm1257_vm15 = vcmp.eq.f32.partialorder %v3500_v44, inf }
 0x23b   :  { %v1317_v0 = vadd.f32 %v1153_v4, %v753_v62  ;;  %v1376_v16 = vpack.c.bf16 %v753_v62, %v751_v19  ;;  %v1174_v19 = vsel %vm1173_vm2, %v3379_v59, %v1172_v42  ;;  %v3454_v30 = vpop.f32.mrf.mxu0  ;;  %v1215_v4 = vmul.f32 %v3456_v6, %v3445_v34 }
 0x23c   :  { %v1195_v62 = vmul.f32 %v2599_v15, %v1194_v63  ;;  %vm1259_vm2 = vcmp.eq.f32.partialorder %v3500_v44, 0.0 }
 0x23d   :  { %2383 = vmatmul.msk.bf16.gmra.mxu2 %vm236_vm0, %v1369_v24  ;;  %2390 = vmatmul.msk.bf16.gmra.mxu3 %vm236_vm0, %v1376_v16  ;;  %v2364_v32 = vadd.f32 -1.0, %v1317_v0  ;;  %v2528_v24 = vld [vmem:[%s3938_s2 + $0x58] sm:$0xff]  ;;  %v1205_v0 = vmul.f32 0.5, %v1204_v52 }
 0x23e   :  { %2476 = vmatmul.msk.bf16.gmra.mxu0 %vm236_vm0, %v2528_v24  ;;  %v1196_v54 = vmul.f32 %v1195_v62, %v3412_v56 }
 0x23f   :  { %2081 = vperm.xlu1 %2546, %v2364_v32   ;;  %v1206_v5 = vsub.f32 1.5, %v1205_v0  ;;  %v3488_v32 = vpop.xlane.xlu0 %900  ;;  %v1224_v0 = vand.u32 2147483648, %v3445_v34 }
 0x240   :  { %v755_v38 = vpop.f32.mrf.mxu2  ;;  %vm1245_vm13 = vcmp.eq.f32.partialorder %v3488_v32, inf  ;;  %vm1247_vm14 = vcmp.eq.f32.partialorder %v3488_v32, 0.0 }
 0x241   :  { %v756_v45 = vadd.f32 %v3063_v31, %v755_v38  ;;  %v1176_v31 = vand.u32 2147483648, %v3379_v59  ;;  %v3465_v59 = vpop.xlane.xlu2 %897  ;;  %v1198_v38 = vsel %vm1197_vm5, %v3412_v56, %v1196_v54 }
 0x242   :  { %2604 = vrsqrt.f32 %v3465_v59  ;;  %vm1233_vm11 = vcmp.eq.f32.partialorder %v3465_v59, inf  ;;  %vm1235_vm12 = vcmp.eq.f32.partialorder %v3465_v59, 0.0 }
 0x243   :  { %v1318_v8 = vadd.f32 %v1165_v39, %v756_v45  ;;  %v1177_v57 = vsel %vm1175_vm3, %v1176_v31, %v1174_v19  ;;  %v3480_v25 = vpop.f32.mrf.mxu0  ;;  %2606 = vrsqrt.f32 %v3488_v32  ;;  %v1200_v39 = vand.u32 2147483648, %v3412_v56 }
 0x244   :  { %2608 = vrsqrt.f32 %v3500_v44 }
 0x245   :  { %v2365_v29 = vadd.f32 -1.0, %v1318_v8  ;;  %v1201_v24 = vsel %vm1199_vm6, %v1200_v39, %v1198_v38 }
 0x247   :  { %2086 = vperm.xlu0 %2545, %v2365_v29  }
 0x248   :  { %v757_v48 = vpop.f32.mrf.mxu2  ;;  %v2605_v15 = vpop.eup %2604 }
 0x249   :  { %v758_v47 = vadd.f32 %v3461_v43, %v757_v48  ;;  %v1227_v7 = vmul.f32 %v2605_v15, %v3465_v59  ;;  %v2607_v31 = vpop.eup %2606  ;;  %v3521_v41 = vpop.xlane.xlu2 %906 }
 0x24a   :  { %v1239_v48 = vmul.f32 %v2607_v31, %v3488_v32  ;;  %v2609_v62 = vpop.eup %2608  ;;  %2610 = vrsqrt.f32 %v3521_v41  ;;  %vm1269_vm3 = vcmp.eq.f32.partialorder %v3521_v41, inf  ;;  %vm1271_vm4 = vcmp.eq.f32.partialorder %v3521_v41, 0.0 }
 0x24b   :  { %v1319_v53 = vadd.f32 %v1177_v57, %v758_v47  ;;  %v1377_v1 = vpack.c.bf16 %v758_v47, %v756_v45  ;;  %v1207_v45 = vmul.f32 %v2601_v11, %v1206_v5  ;;  %v1228_v8 = vmul.f32 %v2605_v15, %v1227_v7  ;;  %v3496_v36 = vpop.f32.mrf.mxu0 }
 0x24c   :  { %v1212_v57 = vand.u32 2147483648, %v3426_v17  ;;  %v1240_v55 = vmul.f32 %v2607_v31, %v1239_v48 }
 0x24d   :  { %2384 = vmatmul.msk.bf16.gmra.mxu2 %vm236_vm0, %v1370_v20  ;;  %2391 = vmatmul.msk.bf16.gmra.mxu3 %vm236_vm0, %v1377_v1  ;;  %v2366_v46 = vadd.f32 -1.0, %v1319_v53  ;;  %v1216_v20 = vmul.f32 %v3456_v6, %v1215_v4  ;;  %v1208_v29 = vmul.f32 %v1207_v45, %v3426_v17  ;;  %v1229_v63 = vmul.f32 0.5, %v1228_v8 }
 0x24e   :  { %2477 = vmatmul.msk.bf16.gmra.mxu0 %vm236_vm0, %v2529_v37 }
 0x24f   :  { %2091 = vperm.xlu2 %2544, %v2366_v46   ;;  %v1217_v42 = vmul.f32 0.5, %v1216_v20  ;;  %v1210_v2 = vsel %vm1209_vm7, %v3426_v17, %v1208_v29  ;;  %v1230_v4 = vsub.f32 1.5, %v1229_v63 }
 0x250   :  { %v760_v16 = vpop.f32.mrf.mxu2  ;;  %v1213_v1 = vsel %vm1211_vm8, %v1212_v57, %v1210_v2  ;;  %v2611_v7 = vpop.eup %2610  ;;  %v1248_v2 = vand.u32 2147483648, %v3488_v32 }
 0x251   :  { %v761_v35 = vadd.f32 %v3461_v43, %v760_v16  ;;  %v1218_v19 = vsub.f32 1.5, %v1217_v42  ;;  %v1231_v16 = vmul.f32 %v2605_v15, %v1230_v4  ;;  %v1263_v42 = vmul.f32 %v2611_v7, %v3521_v41 }
 0x253   :  { %v1320_v13 = vadd.f32 %v1189_v22, %v761_v35  ;;  %v1219_v52 = vmul.f32 %v3456_v6, %v1218_v19  ;;  %v3514_v10 = vpop.f32.mrf.mxu0  ;;  %v1251_v6 = vmul.f32 %v2609_v62, %v3500_v44  ;;  %v1232_v37 = vmul.f32 %v1231_v16, %v3465_v59 }
 0x255   :  { %v2367_v14 = vadd.f32 -1.0, %v1320_v13  ;;  %v1220_v28 = vmul.f32 %v1219_v52, %v3445_v34  ;;  %v1252_v15 = vmul.f32 %v2609_v62, %v1251_v6 }
 0x257   :  { %2096 = vperm.xlu1 %2546, %v2367_v14   ;;  %v1222_v54 = vsel %vm1221_vm9, %v3445_v34, %v1220_v28  ;;  %v3535_v14 = vpop.xlane.xlu0 %909  ;;  %v1253_v29 = vmul.f32 0.5, %v1252_v15  ;;  %vm2176_vm9 = vcmask 31744  }
 0x258   :  { %v762_v9 = vpop.f32.mrf.mxu2  ;;  %v1225_v20 = vsel %vm1223_vm10, %v1224_v0, %v1222_v54  ;;  %2612 = vrsqrt.f32 %v3535_v14  ;;  %vm1281_vm1 = vcmp.eq.f32.partialorder %v3535_v14, inf  ;;  %vm1283_vm5 = vcmp.eq.f32.partialorder %v3535_v14, 0.0 }
 0x259   :  { %v763_v61 = vadd.f32 %v3461_v43, %v762_v9  ;;  %v1234_v9 = vsel %vm1233_vm11, %v3465_v59, %v1232_v37  ;;  %v1254_v3 = vsub.f32 1.5, %v1253_v29 }
 0x25b   :  { %v1321_v56 = vadd.f32 %v1201_v24, %v763_v61  ;;  %v1378_v11 = vpack.c.bf16 %v763_v61, %v761_v35  ;;  %v1241_v35 = vmul.f32 0.5, %v1240_v55  ;;  %v3531_v13 = vpop.f32.mrf.mxu0  ;;  %v1236_v24 = vand.u32 2147483648, %v3465_v59 }
 0x25c   :  { %v1255_v4 = vmul.f32 %v2609_v62, %v1254_v3 }
 0x25d   :  { %v2368_v47 = vadd.f32 -1.0, %v1321_v56  ;;  %2385 = vmatmul.msk.bf16.gmra.mxu2 %vm236_vm0, %v1371_v49  ;;  %2392 = vmatmul.msk.bf16.gmra.mxu3 %vm236_vm0, %v1378_v11  ;;  %v2530_v49 = vld [vmem:[%s3938_s2 + $0x68] sm:$0xff]  ;;  %v1242_v39 = vsub.f32 1.5, %v1241_v35  ;;  %v1237_v56 = vsel %vm1235_vm12, %v1236_v24, %v1234_v9  ;;  %v1264_v11 = vmul.f32 %v2611_v7, %v1263_v42 }
 0x25e   :  { %2478 = vmatmul.msk.bf16.gmra.mxu0 %vm236_vm0, %v2530_v49  ;;  %v2613_v57 = vpop.eup %2612  ;;  %v1256_v0 = vmul.f32 %v1255_v4, %v3500_v44  ;;  %v1272_v42 = vand.u32 2147483648, %v3521_v41 }
 0x25f   :  { %2101 = vperm.xlu0 %2545, %v2368_v47   ;;  %v1243_v61 = vmul.f32 %v2607_v31, %v1242_v39  ;;  %v1275_v31 = vmul.f32 %v2613_v57, %v3535_v14  ;;  %v1265_v52 = vmul.f32 0.5, %v1264_v11 }
 0x260   :  { %v765_v53 = vpop.f32.mrf.mxu2 }
 0x261   :  { %v766_v46 = vadd.f32 %v3461_v43, %v765_v53  ;;  %v1244_v47 = vmul.f32 %v1243_v61, %v3488_v32  ;;  %v1266_v55 = vsub.f32 1.5, %v1265_v52  ;;  %v1276_v16 = vmul.f32 %v2613_v57, %v1275_v31 }
 0x263   :  { %v1322_v17 = vadd.f32 %v1213_v1, %v766_v46  ;;  %v3547_v48 = vpop.f32.mrf.mxu0  ;;  %v1246_v1 = vsel %vm1245_vm13, %v3488_v32, %v1244_v47  ;;  %v1260_v32 = vand.u32 2147483648, %v3500_v44  ;;  %v1267_v62 = vmul.f32 %v2611_v7, %v1266_v55 }
 0x264   :  { %v1249_v28 = vsel %vm1247_vm14, %v1248_v2, %v1246_v1  ;;  %v1277_v37 = vmul.f32 0.5, %v1276_v16 }
 0x265   :  { %v2369_v22 = vadd.f32 -1.0, %v1322_v17  ;;  %v1268_v15 = vmul.f32 %v1267_v62, %v3521_v41 }
 0x266   :  { %v1278_v12 = vsub.f32 1.5, %v1277_v37 }
 0x267   :  { %2106 = vperm.xlu2 %2544, %v2369_v22  }
 0x268   :  { %v767_v5 = vpop.f32.mrf.mxu2  ;;  %v1279_v24 = vmul.f32 %v2613_v57, %v1278_v12 }
 0x269   :  { %v768_v38 = vadd.f32 %v3461_v43, %v767_v5 }
 0x26a   :  { %v1280_v11 = vmul.f32 %v1279_v24, %v3535_v14 }
 0x26b   :  { %v1323_v34 = vadd.f32 %v1225_v20, %v768_v38  ;;  %v1379_v45 = vpack.c.bf16 %v768_v38, %v766_v46  ;;  %v3563_v49 = vpop.f32.mrf.mxu0  ;;  %v1258_v20 = vsel %vm1257_vm15, %v3500_v44, %v1256_v0  ;;  %v1270_v44 = vsel %vm1269_vm3, %v3521_v41, %v1268_v15 }
 0x26c   :  { %v1261_v39 = vsel %vm1259_vm2, %v1260_v32, %v1258_v20  ;;  %v1273_v29 = vsel %vm1271_vm4, %v1272_v42, %v1270_v44  ;;  %v1282_v41 = vsel %vm1281_vm1, %v3535_v14, %v1280_v11 }
 0x26d   :  { %v2370_v8 = vadd.f32 -1.0, %v1323_v34  ;;  %2386 = vmatmul.msk.bf16.gmra.mxu2 %vm236_vm0, %v1372_v40  ;;  %2393 = vmatmul.msk.bf16.gmra.mxu3 %vm236_vm0, %v1379_v45  ;;  %v3554_v40 = vpop.xlane.xlu1 %912 }
 0x26e   :  { %2614 = vrsqrt.f32 %v3554_v40  ;;  %2479 = vmatmul.msk.bf16.gmra.mxu0 %vm236_vm0, %v2531_v51  ;;  %v1284_v51 = vand.u32 2147483648, %v3535_v14  ;;  %vm1293_vm6 = vcmp.eq.f32.partialorder %v3554_v40, inf  ;;  %vm1295_vm7 = vcmp.eq.f32.partialorder %v3554_v40, 0.0 }
 0x26f   :  { %2111 = vperm.xlu1 %2546, %v2370_v8  }
 0x270   :  { %v770_v19 = vpop.f32.mrf.mxu2  ;;  %v1285_v2 = vsel %vm1283_vm5, %v1284_v51, %v1282_v41 }
 0x271   :  { %v771_v63 = vadd.f32 %v3461_v43, %v770_v19 }
 0x273   :  { %v1324_v59 = vadd.f32 %v1237_v56, %v771_v63  ;;  %v1704_v34 = vpop.f32.mrf.mxu0 }
 0x274   :  { %v2615_v17 = vpop.eup %2614 }
 0x275   :  { %v2371_v53 = vadd.f32 -1.0, %v1324_v59  ;;  %v1287_v35 = vmul.f32 %v2615_v17, %v3554_v40 }
 0x277   :  { %2116 = vperm.xlu0 %2545, %v2371_v53   ;;  %v1288_v26 = vmul.f32 %v2615_v17, %v1287_v35 }
 0x278   :  { %v772_v46 = vpop.f32.mrf.mxu2 }
 0x279   :  { %v773_v6 = vadd.f32 %v3461_v43, %v772_v46  ;;  %v1289_v8 = vmul.f32 0.5, %v1288_v26  ;;  %v1296_v46 = vand.u32 2147483648, %v3554_v40 }
 0x27b   :  { %v1325_v22 = vadd.f32 %v1249_v28, %v773_v6  ;;  %v1380_v54 = vpack.c.bf16 %v773_v6, %v771_v63  ;;  %v1706_v19 = vpop.f32.mrf.mxu0  ;;  %v1290_v63 = vsub.f32 1.5, %v1289_v8 }
 0x27d   :  { %v2372_v5 = vadd.f32 -1.0, %v1325_v22  ;;  %2387 = vmatmul.msk.bf16.gmra.mxu2 %vm236_vm0, %v1373_v50  ;;  %2394 = vmatmul.msk.bf16.gmra.mxu3 %vm236_vm0, %v1380_v54  ;;  %v2532_v50 = vld [vmem:[%s3938_s2 + $0x78] sm:$0xff]  ;;  %v1291_v57 = vmul.f32 %v2615_v17, %v1290_v63 }
 0x27e   :  { %2480 = vmatmul.msk.bf16.gmra.mxu0 %vm236_vm0, %v2532_v50 }
 0x27f   :  { %2121 = vperm.xlu2 %2544, %v2372_v5   ;;  %v1292_v1 = vmul.f32 %v1291_v57, %v3554_v40 }
 0x280   :  { %v775_v38 = vpop.f32.mrf.mxu2 }
 0x281   :  { %v776_v7 = vadd.f32 %v3461_v43, %v775_v38  ;;  %v1294_v55 = vsel %vm1293_vm6, %v3554_v40, %v1292_v1  ;;  %v3606_v40 = vld [vmem:[%s3940_s11] ss:$0 sm:$0xff] }
 0x282   :  { %v1297_v17 = vsel %vm1295_vm7, %v1296_v46, %v1294_v55 }
 0x283   :  { %v1326_v45 = vadd.f32 %v1261_v39, %v776_v7  ;;  %v1709_v52 = vpop.f32.mrf.mxu0 }
 0x285   :  { %v2373_v9 = vadd.f32 -1.0, %v1326_v45 }
 0x287   :  { %2126 = vperm.xlu1 %2546, %v2373_v9  }
 0x288   :  { %v777_v61 = vpop.f32.mrf.mxu2 }
 0x289   :  { %v778_v56 = vadd.f32 %v3461_v43, %v777_v61 }
 0x28b   :  { %v1327_v47 = vadd.f32 %v1273_v29, %v778_v56  ;;  %v1381_v3 = vpack.c.bf16 %v778_v56, %v776_v7  ;;  %v1711_v0 = vpop.f32.mrf.mxu0 }
 0x28d   :  { %v2374_v59 = vadd.f32 -1.0, %v1327_v47  ;;  %2395 = vmatmul.msk.bf16.gmra.mxu3 %vm236_vm0, %v1381_v3 }
 0x28f   :  { %2131 = vperm.xlu0 %2545, %v2374_v59  }
 0x290   :  { %v780_v31 = vpop.f32.mrf.mxu2 }
 0x291   :  { %v781_v53 = vadd.f32 %v3461_v43, %v780_v31 }
 0x293   :  { %v1328_v4 = vadd.f32 %v1285_v2, %v781_v53  ;;  %v1714_v62 = vpop.f32.mrf.mxu0 }
 0x295   :  { %v2375_v28 = vadd.f32 -1.0, %v1328_v4 }
 0x297   :  { %2136 = vperm.xlu2 %2544, %v2375_v28  }
 0x298   :  { %v782_v14 = vpop.f32.mrf.mxu2 }
 0x299   :  { %v783_v6 = vadd.f32 %v3461_v43, %v782_v14 }
 0x29b   :  { %v1329_v16 = vadd.f32 %v1297_v17, %v783_v6  ;;  %v1382_v22 = vpack.c.bf16 %v783_v6, %v781_v53  ;;  %v1716_v42 = vpop.f32.mrf.mxu0 }
 0x29d   :  { %v2376_v54 = vadd.f32 -1.0, %v1329_v16  ;;  %2396 = vmatmul.msk.bf16.gmra.mxu3 %vm236_vm0, %v1382_v22 }
 0x29f   :  { %2141 = vperm.xlu1 %2546, %v2376_v54  }
 0x2a0   :  { %v1446_v35 = vpop.f32.mrf.mxu2  ;;  %v1481_v32 = vpop.f32.mrf.mxu3 }
 0x2a1   :  { %v1670_v5 = vadd.f32 %v3333_v60, %v1446_v35  ;;  %v1705_v20 = vadd.f32 %v1704_v34, %v1481_v32 }
 0x2a3   :  { %v1752_v38 = vadd.f32 %v3606_v40, %v1670_v5  ;;  %v1766_v39 = vadd.f32 %v3606_v40, %v1705_v20  ;;  %v1719_v29 = vpop.f32.mrf.mxu0 }
 0x2a5   :  { %v1784_v60 = vmax.f32 %v1752_v38, 0.0  ;;  %v1798_v50 = vmax.f32 %v1766_v39, 0.0 }
 0x2a8   :  { %v1448_v37 = vpop.f32.mrf.mxu2  ;;  %v1483_v43 = vpop.f32.mrf.mxu3 }
 0x2a9   :  { %v1672_v15 = vadd.f32 %v3350_v33, %v1448_v37  ;;  %v1707_v7 = vadd.f32 %v1706_v19, %v1483_v43 }
 0x2ab   :  { %v1753_v12 = vadd.f32 %v3606_v40, %v1672_v15  ;;  %v1767_v26 = vadd.f32 %v3606_v40, %v1707_v7  ;;  %v1721_v4 = vpop.f32.mrf.mxu0 }
 0x2ad   :  { %v1785_v45 = vmax.f32 %v1753_v12, 0.0  ;;  %v1799_v44 = vmax.f32 %v1767_v26, 0.0 }
 0x2af   :  { %v1819_v9 = vpack.c.bf16 %v1785_v45, %v1784_v60  ;;  %v3613_v34 = vpack.c.bf16 %v1799_v44, %v1798_v50 }
 0x2b0   :  { %v1451_v24 = vpop.f32.mrf.mxu2  ;;  %v1486_v8 = vpop.f32.mrf.mxu3 }
 0x2b1   :  { %2485 = vmatmul.msk.bf16.vlgmr.msrb.gmra.mxu3 %vm236_vm0, %v1819_v9  ;;  %v1675_v61 = vadd.f32 %v3371_v18, %v1451_v24  ;;  %v1710_v33 = vadd.f32 %v1709_v52, %v1486_v8 }
 0x2b3   :  { %v1754_v11 = vadd.f32 %v3606_v40, %v1675_v61  ;;  %v1768_v63 = vadd.f32 %v3606_v40, %v1710_v33 }
 0x2b5   :  { %v1786_v41 = vmax.f32 %v1754_v11, 0.0  ;;  %v1800_v57 = vmax.f32 %v1768_v63, 0.0 }
 0x2b8   :  { %v1453_v19 = vpop.f32.mrf.mxu2  ;;  %v1488_v56 = vpop.f32.mrf.mxu3 }
 0x2b9   :  { %v1677_v47 = vadd.f32 %v3387_v23, %v1453_v19  ;;  %v1712_v3 = vadd.f32 %v1711_v0, %v1488_v56 }
 0x2bb   :  { %v1755_v51 = vadd.f32 %v3606_v40, %v1677_v47  ;;  %v1769_v59 = vadd.f32 %v3606_v40, %v1712_v3  ;;  %v1724_v54 = vpop.f32.mrf.mxu0 }
 0x2bd   :  { %v1787_v31 = vmax.f32 %v1755_v51, 0.0  ;;  %v1801_v2 = vmax.f32 %v1769_v59, 0.0 }
 0x2bf   :  { %v3622_v18 = vpack.c.bf16 %v1801_v2, %v1800_v57  ;;  %v1820_v52 = vpack.c.bf16 %v1787_v31, %v1786_v41 }
 0x2c0   :  { %v1456_v53 = vpop.f32.mrf.mxu2  ;;  %v1491_v1 = vpop.f32.mrf.mxu3 }
 0x2c1   :  { %2486 = vmatmul.msk.bf16.gmra.mxu3 %vm236_vm0, %v1820_v52  ;;  %v1680_v46 = vadd.f32 %v3405_v21, %v1456_v53  ;;  %v1715_v23 = vadd.f32 %v1714_v62, %v1491_v1 }
 0x2c3   :  { %v1756_v14 = vadd.f32 %v3606_v40, %v1680_v46  ;;  %v1770_v17 = vadd.f32 %v3606_v40, %v1715_v23  ;;  %v1726_v39 = vpop.f32.mrf.mxu0 }
 0x2c5   :  { %v1788_v35 = vmax.f32 %v1756_v14, 0.0  ;;  %v1802_v32 = vmax.f32 %v1770_v17, 0.0 }
 0x2c8   :  { %v1458_v28 = vpop.f32.mrf.mxu2  ;;  %v1493_v55 = vpop.f32.mrf.mxu3 }
 0x2c9   :  { %v1682_v6 = vadd.f32 %v3422_v27, %v1458_v28  ;;  %v1717_v0 = vadd.f32 %v1716_v42, %v1493_v55 }
 0x2cb   :  { %v1757_v16 = vadd.f32 %v3606_v40, %v1682_v6  ;;  %v1771_v22 = vadd.f32 %v3606_v40, %v1717_v0  ;;  %v1729_v33 = vpop.f32.mrf.mxu0 }
 0x2cd   :  { %v1789_v5 = vmax.f32 %v1757_v16, 0.0  ;;  %v1803_v20 = vmax.f32 %v1771_v22, 0.0 }
 0x2cf   :  { %v3631_v21 = vpack.c.bf16 %v1803_v20, %v1802_v32  ;;  %v1821_v62 = vpack.c.bf16 %v1789_v5, %v1788_v35 }
 0x2d0   :  { %v1461_v37 = vpop.f32.mrf.mxu2  ;;  %v1496_v43 = vpop.f32.mrf.mxu3 }
 0x2d1   :  { %2487 = vmatmul.msk.bf16.gmra.mxu3 %vm236_vm0, %v1821_v62  ;;  %v1685_v38 = vadd.f32 %v3438_v58, %v1461_v37  ;;  %v1720_v27 = vadd.f32 %v1719_v29, %v1496_v43 }
 0x2d3   :  { %v1758_v12 = vadd.f32 %v3606_v40, %v1685_v38  ;;  %v1772_v26 = vadd.f32 %v3606_v40, %v1720_v27  ;;  %v1731_v41 = vpop.f32.mrf.mxu0 }
 0x2d5   :  { %v1790_v42 = vmax.f32 %v1758_v12, 0.0  ;;  %v1804_v9 = vmax.f32 %v1772_v26, 0.0 }
 0x2d8   :  { %v1463_v15 = vpop.f32.mrf.mxu2  ;;  %v1498_v7 = vpop.f32.mrf.mxu3 }
 0x2d9   :  { %v1687_v60 = vadd.f32 %v3454_v30, %v1463_v15  ;;  %v1722_v50 = vadd.f32 %v1721_v4, %v1498_v7 }
 0x2db   :  { %v1759_v45 = vadd.f32 %v3606_v40, %v1687_v60  ;;  %v1773_v44 = vadd.f32 %v3606_v40, %v1722_v50  ;;  %v1734_v28 = vpop.f32.mrf.mxu0 }
 0x2dd   :  { %v1791_v24 = vmax.f32 %v1759_v45, 0.0  ;;  %v1805_v8 = vmax.f32 %v1773_v44, 0.0 }
 0x2df   :  { %v1822_v58 = vpack.c.bf16 %v1791_v24, %v1790_v42  ;;  %v3640_v61 = vpack.c.bf16 %v1805_v8, %v1804_v9 }
 0x2e0   :  { %v1466_v29 = vpop.f32.mrf.mxu2  ;;  %v1501_v19 = vpop.f32.mrf.mxu3 }
 0x2e1   :  { %2488 = vmatmul.msk.bf16.gmra.mxu3 %vm236_vm0, %v1822_v58  ;;  %v1690_v56 = vadd.f32 %v3480_v25, %v1466_v29  ;;  %v1725_v30 = vadd.f32 %v1724_v54, %v1501_v19 }
 0x2e3   :  { %v1760_v47 = vadd.f32 %v3606_v40, %v1690_v56  ;;  %v1774_v3 = vadd.f32 %v3606_v40, %v1725_v30  ;;  %v1736_v37 = vpop.f32.mrf.mxu0 }
 0x2e5   :  { %v1792_v2 = vmax.f32 %v1760_v47, 0.0  ;;  %v1806_v52 = vmax.f32 %v1774_v3, 0.0 }
 0x2e8   :  { %v1468_v11 = vpop.f32.mrf.mxu2  ;;  %v1503_v63 = vpop.f32.mrf.mxu3 }
 0x2e9   :  { %v1692_v51 = vadd.f32 %v3496_v36, %v1468_v11  ;;  %v1727_v59 = vadd.f32 %v1726_v39, %v1503_v63 }
 0x2eb   :  { %v1761_v57 = vadd.f32 %v3606_v40, %v1692_v51  ;;  %v1775_v31 = vadd.f32 %v3606_v40, %v1727_v59  ;;  %v1739_v15 = vpop.f32.mrf.mxu0 }
 0x2ed   :  { %v1793_v53 = vmax.f32 %v1761_v57, 0.0  ;;  %v1807_v1 = vmax.f32 %v1775_v31, 0.0 }
 0x2ef   :  { %v1823_v25 = vpack.c.bf16 %v1793_v53, %v1792_v2  ;;  %v3649_v4 = vpack.c.bf16 %v1807_v1, %v1806_v52 }
 0x2f0   :  { %v1471_v46 = vpop.f32.mrf.mxu2  ;;  %v1506_v23 = vpop.f32.mrf.mxu3 }
 0x2f1   :  { %2489 = vmatmul.msk.bf16.gmra.mxu3 %vm236_vm0, %v1823_v25  ;;  %v1695_v36 = vadd.f32 %v3514_v10, %v1471_v46  ;;  %v1730_v55 = vadd.f32 %v1729_v33, %v1506_v23  ;;  %v1981_v25 = vlaneseq }
 0x2f3   :  { %v1762_v6 = vadd.f32 %v3606_v40, %v1695_v36  ;;  %v1776_v0 = vadd.f32 %v3606_v40, %v1730_v55  ;;  %v1741_v19 = vpop.f32.mrf.mxu0  ;;  %v3680_v36 = vand.u32 127, %v1981_v25 }
 0x2f5   :  { %v1794_v32 = vmax.f32 %v1762_v6, 0.0  ;;  %v1808_v5 = vmax.f32 %v1776_v0, 0.0  ;;  %vm1983_vm8 = vcmp.eq.s32.totalorder %v3680_v36, 3  ;;  %v1992_v0 = vpop.permute.xlu0 %1991 }
 0x2f8   :  { %v1473_v14 = vpop.f32.mrf.mxu2  ;;  %v1508_v17 = vpop.f32.mrf.mxu3 }
 0x2f9   :  { %v1697_v16 = vadd.f32 %v3531_v13, %v1473_v14  ;;  %v1732_v22 = vadd.f32 %v1731_v41, %v1508_v17  ;;  %v1987_v14 = vpop.permute.xlu2 %1986 }
 0x2fb   :  { %v1763_v54 = vadd.f32 %v3606_v40, %v1697_v16  ;;  %v1777_v35 = vadd.f32 %v3606_v40, %v1732_v22  ;;  %v1744_v47 = vpop.f32.mrf.mxu0 }
 0x2fd   :  { %v1795_v20 = vmax.f32 %v1763_v54, 0.0  ;;  %v1809_v62 = vmax.f32 %v1777_v35, 0.0  ;;  %v1997_v35 = vpop.permute.xlu1 %1996 }
 0x2ff   :  { %v1824_v10 = vpack.c.bf16 %v1795_v20, %v1794_v32  ;;  %v3658_v43 = vpack.c.bf16 %v1809_v62, %v1808_v5 }
 0x300   :  { %v1476_v38 = vpop.f32.mrf.mxu2  ;;  %v1511_v27 = vpop.f32.mrf.mxu3 }
 0x301   :  { %2490 = vmatmul.msk.bf16.gmra.mxu3 %vm236_vm0, %v1824_v10  ;;  %v1700_v39 = vadd.f32 %v3547_v48, %v1476_v38  ;;  %v1735_v13 = vadd.f32 %v1734_v28, %v1511_v27  ;;  %v2002_v5 = vpop.permute.xlu2 %2001 }
 0x303   :  { %v1764_v26 = vadd.f32 %v3606_v40, %v1700_v39  ;;  %v1778_v60 = vadd.f32 %v3606_v40, %v1735_v13  ;;  %v1746_v31 = vpop.f32.mrf.mxu0 }
 0x305   :  { %v1796_v9 = vmax.f32 %v1764_v26, 0.0  ;;  %v1810_v24 = vmax.f32 %v1778_v60, 0.0 }
 0x308   :  { %v1478_v7 = vpop.f32.mrf.mxu2  ;;  %v1513_v12 = vpop.f32.mrf.mxu3 }
 0x309   :  { %v1702_v50 = vadd.f32 %v3563_v49, %v1478_v7  ;;  %v1737_v45 = vadd.f32 %v1736_v37, %v1513_v12  ;;  %v2007_v38 = vpop.permute.xlu2 %2006 }
 0x30b   :  { %v1765_v44 = vadd.f32 %v3606_v40, %v1702_v50  ;;  %v1779_v42 = vadd.f32 %v3606_v40, %v1737_v45 }
 0x30d   :  { %v1797_v8 = vmax.f32 %v1765_v44, 0.0  ;;  %v1811_v58 = vmax.f32 %v1779_v42, 0.0 }
 0x30f   :  { %v1825_v48 = vpack.c.bf16 %v1797_v8, %v1796_v9  ;;  %v3667_v33 = vpack.c.bf16 %v1811_v58, %v1810_v24  ;;  %v2027_v24 = vpop.permute.xlu0 %2026 }
 0x310   :  { %v1516_v29 = vpop.f32.mrf.mxu3 }
 0x311   :  { %2491 = vmatmul.msk.bf16.gmra.mxu3 %vm236_vm0, %v1825_v48  ;;  %v1740_v56 = vadd.f32 %v1739_v15, %v1516_v29  ;;  %v2012_v15 = vpop.permute.xlu1 %2011  ;;  %v2017_v26 = vpop.permute.xlu2 %2016 }
 0x313   :  { %v1780_v49 = vadd.f32 %v3606_v40, %v1740_v56 }
 0x315   :  { %v1812_v3 = vmax.f32 %v1780_v49, 0.0 }
 0x318   :  { %v1518_v30 = vpop.f32.mrf.mxu3 }
 0x319   :  { %v1742_v11 = vadd.f32 %v1741_v19, %v1518_v30  ;;  %v2022_v44 = vpop.permute.xlu1 %2021  ;;  %v2032_v29 = vpop.permute.xlu2 %2031 }
 0x31b   :  { %v1781_v63 = vadd.f32 %v3606_v40, %v1742_v11 }
 0x31d   :  { %v1813_v51 = vmax.f32 %v1781_v63, 0.0 }
 0x31f   :  { %v3672_v59 = vpack.c.bf16 %v1813_v51, %v1812_v3 }
 0x320   :  { %v1521_v41 = vpop.f32.mrf.mxu3 }
 0x321   :  { %2492 = vmatmul.msk.bf16.gmra.mxu3 %vm236_vm0, %v3613_v34  ;;  %v1745_v57 = vadd.f32 %v1744_v47, %v1521_v41  ;;  %v3687_v34 = vld [vmem:[%s3941_s13] ss:$0 sm:$0xff]  ;;  %v2037_v30 = vpop.permute.xlu1 %2036  ;;  %v2042_v47 = vpop.permute.xlu0 %2041 }
 0x322   :  { %v2047_v41 = vpop.permute.xlu2 %2046 }
 0x323   :  { %v1782_v52 = vadd.f32 %v3606_v40, %v1745_v57 }
 0x325   :  { %v1814_v46 = vmax.f32 %v1782_v52, 0.0 }
 0x328   :  { %v1523_v2 = vpop.f32.mrf.mxu3 }
 0x329   :  { %v1747_v53 = vadd.f32 %v1746_v31, %v1523_v2  ;;  %v2052_v52 = vpop.permute.xlu1 %2051  ;;  %v2057_v25 = vpop.permute.xlu0 %2056 }
 0x32b   :  { %v1783_v1 = vadd.f32 %v3606_v40, %v1747_v53 }
 0x32d   :  { %v1815_v23 = vmax.f32 %v1783_v1, 0.0 }
 0x32f   :  { %v3678_v28 = vpack.c.bf16 %v1815_v23, %v1814_v46 }
 0x331   :  { %2493 = vmatmul.msk.bf16.gmra.mxu3 %vm236_vm0, %v3622_v18 }
 0x334   :  { %v1901_v55 = vpop.f32.mrf.mxu3 }
 0x335   :  { %v1902_v40 = vadd.f32 %v3687_v34, %v1901_v55 }
 0x337   :  { %v2144_v17 = vsel %vm1983_vm8, %v1987_v14, %v1902_v40  ;;  %v2062_v40 = vpop.permute.xlu2 %2061 }
 0x338   :  { %2177 = vst.msk [vmem:[%s3942_s14] sm:$0xff] %vm2176_vm9, %v2144_v17 }
 0x33c   :  { %v1903_v18 = vpop.f32.mrf.mxu3 }
 0x33d   :  { %v1904_v6 = vadd.f32 %v3687_v34, %v1903_v18  ;;  %v2067_v18 = vpop.permute.xlu1 %2066 }
 0x33f   :  { %v2145_v16 = vsel %vm1983_vm8, %v1992_v0, %v1904_v6 }
 0x340   :  { %2178 = vst.msk [vmem:[%s3942_s14 + $0x8] sm:$0xff] %vm2176_vm9, %v2145_v16 }
 0x341   :  { %2494 = vmatmul.msk.bf16.gmra.mxu3 %vm236_vm0, %v3631_v21 }
 0x344   :  { %v1906_v22 = vpop.f32.mrf.mxu3 }
 0x345   :  { %v1907_v54 = vadd.f32 %v3687_v34, %v1906_v22  ;;  %v2072_v22 = vpop.permute.xlu0 %2071 }
 0x347   :  { %v2146_v32 = vsel %vm1983_vm8, %v1997_v35, %v1907_v54 }
 0x348   :  { %2179 = vst.msk [vmem:[%s3942_s14 + $0x10] sm:$0xff] %vm2176_vm9, %v2146_v32 }
 0x34c   :  { %v1908_v20 = vpop.f32.mrf.mxu3 }
 0x34d   :  { %v1909_v62 = vadd.f32 %v3687_v34, %v1908_v20 }
 0x34f   :  { %v2147_v37 = vsel %vm1983_vm8, %v2002_v5, %v1909_v62  ;;  %v2077_v5 = vpop.permute.xlu2 %2076 }
 0x350   :  { %2180 = vst.msk [vmem:[%s3942_s14 + $0x18] sm:$0xff] %vm2176_vm9, %v2147_v37 }
 0x351   :  { %2495 = vmatmul.msk.bf16.gmra.mxu3 %vm236_vm0, %v3640_v61 }
 0x354   :  { %v1911_v21 = vpop.f32.mrf.mxu3 }
 0x355   :  { %v1912_v10 = vadd.f32 %v3687_v34, %v1911_v21  ;;  %v2082_v21 = vpop.permute.xlu1 %2081 }
 0x357   :  { %v2148_v27 = vsel %vm1983_vm8, %v2007_v38, %v1912_v10 }
 0x358   :  { %2181 = vst.msk [vmem:[%s3942_s14 + $0x20] sm:$0xff] %vm2176_vm9, %v2148_v27 }
 0x35c   :  { %v1913_v39 = vpop.f32.mrf.mxu3 }
 0x35d   :  { %v1914_v13 = vadd.f32 %v3687_v34, %v1913_v39  ;;  %v2087_v39 = vpop.permute.xlu0 %2086 }
 0x35f   :  { %v2149_v7 = vsel %vm1983_vm8, %v2012_v15, %v1914_v13 }
 0x360   :  { %2182 = vst.msk [vmem:[%s3942_s14 + $0x28] sm:$0xff] %vm2176_vm9, %v2149_v7 }
 0x361   :  { %2496 = vmatmul.msk.bf16.gmra.mxu3 %vm236_vm0, %v3649_v4 }
 0x364   :  { %v1916_v61 = vpop.f32.mrf.mxu3 }
 0x365   :  { %v1917_v12 = vadd.f32 %v3687_v34, %v1916_v61  ;;  %v2092_v61 = vpop.permute.xlu2 %2091 }
 0x367   :  { %v2150_v60 = vsel %vm1983_vm8, %v2017_v26, %v1917_v12 }
 0x368   :  { %2183 = vst.msk [vmem:[%s3942_s14 + $0x30] sm:$0xff] %vm2176_vm9, %v2150_v60 }
 0x36c   :  { %v1918_v50 = vpop.f32.mrf.mxu3 }
 0x36d   :  { %v1919_v45 = vadd.f32 %v3687_v34, %v1918_v50  ;;  %v2097_v50 = vpop.permute.xlu1 %2096 }
 0x36f   :  { %v2151_v42 = vsel %vm1983_vm8, %v2022_v44, %v1919_v45 }
 0x370   :  { %2184 = vst.msk [vmem:[%s3942_s14 + $0x38] sm:$0xff] %vm2176_vm9, %v2151_v42 }
 0x371   :  { %2497 = vmatmul.msk.bf16.gmra.mxu3 %vm236_vm0, %v3658_v43 }
 0x374   :  { %v1921_v4 = vpop.f32.mrf.mxu3 }
 0x375   :  { %v1922_v9 = vadd.f32 %v3687_v34, %v1921_v4  ;;  %v2102_v4 = vpop.permute.xlu0 %2101 }
 0x377   :  { %v2152_v8 = vsel %vm1983_vm8, %v2027_v24, %v1922_v9 }
 0x378   :  { %2185 = vst.msk [vmem:[%s3942_s14 + $0x40] sm:$0xff] %vm2176_vm9, %v2152_v8 }
 0x37c   :  { %v1923_v58 = vpop.f32.mrf.mxu3 }
 0x37d   :  { %v1924_v48 = vadd.f32 %v3687_v34, %v1923_v58  ;;  %v2107_v58 = vpop.permute.xlu2 %2106 }
 0x37f   :  { %v2153_v19 = vsel %vm1983_vm8, %v2032_v29, %v1924_v48 }
 0x380   :  { %2186 = vst.msk [vmem:[%s3942_s14 + $0x48] sm:$0xff] %vm2176_vm9, %v2153_v19 }
 0x381   :  { %2498 = vmatmul.msk.bf16.gmra.mxu3 %vm236_vm0, %v3667_v33 }
 0x384   :  { %v1926_v43 = vpop.f32.mrf.mxu3 }
 0x385   :  { %v1927_v56 = vadd.f32 %v3687_v34, %v1926_v43  ;;  %v2112_v43 = vpop.permute.xlu1 %2111 }
 0x387   :  { %v2154_v49 = vsel %vm1983_vm8, %v2037_v30, %v1927_v56 }
 0x388   :  { %2187 = vst.msk [vmem:[%s3942_s14 + $0x50] sm:$0xff] %vm2176_vm9, %v2154_v49 }
 0x38c   :  { %v1928_v11 = vpop.f32.mrf.mxu3 }
 0x38d   :  { %v1929_v63 = vadd.f32 %v3687_v34, %v1928_v11  ;;  %v2117_v11 = vpop.permute.xlu0 %2116 }
 0x38f   :  { %v2155_v3 = vsel %vm1983_vm8, %v2042_v47, %v1929_v63 }
 0x390   :  { %2188 = vst.msk [vmem:[%s3942_s14 + $0x58] sm:$0xff] %vm2176_vm9, %v2155_v3 }
 0x391   :  { %2499 = vmatmul.msk.bf16.gmra.mxu3 %vm236_vm0, %v3672_v59 }
 0x394   :  { %v1931_v33 = vpop.f32.mrf.mxu3 }
 0x395   :  { %v1932_v51 = vadd.f32 %v3687_v34, %v1931_v33  ;;  %v2122_v33 = vpop.permute.xlu2 %2121 }
 0x397   :  { %v2156_v57 = vsel %vm1983_vm8, %v2047_v41, %v1932_v51 }
 0x398   :  { %2189 = vst.msk [vmem:[%s3942_s14 + $0x60] sm:$0xff] %vm2176_vm9, %v2156_v57 }
 0x39c   :  { %v1933_v31 = vpop.f32.mrf.mxu3 }
 0x39d   :  { %v1934_v2 = vadd.f32 %v3687_v34, %v1933_v31  ;;  %v2127_v31 = vpop.permute.xlu1 %2126 }
 0x39f   :  { %v2157_v53 = vsel %vm1983_vm8, %v2052_v52, %v1934_v2 }
 0x3a0   :  { %2190 = vst.msk [vmem:[%s3942_s14 + $0x68] sm:$0xff] %vm2176_vm9, %v2157_v53 }
 0x3a1   :  { %2500 = vmatmul.msk.bf16.gmra.mxu3 %vm236_vm0, %v3678_v28 }
 0x3a4   :  { %v1936_v59 = vpop.f32.mrf.mxu3 }
 0x3a5   :  { %v1937_v1 = vadd.f32 %v3687_v34, %v1936_v59  ;;  %v2132_v59 = vpop.permute.xlu0 %2131 }
 0x3a7   :  { %v2158_v46 = vsel %vm1983_vm8, %v2057_v25, %v1937_v1 }
 0x3a8   :  { %2191 = vst.msk [vmem:[%s3942_s14 + $0x70] sm:$0xff] %vm2176_vm9, %v2158_v46 }
 0x3ac   :  { %v1938_v23 = vpop.f32.mrf.mxu3 }
 0x3ad   :  { %v1939_v55 = vadd.f32 %v3687_v34, %v1938_v23  ;;  %v2137_v23 = vpop.permute.xlu2 %2136 }
 0x3af   :  { %v2159_v14 = vsel %vm1983_vm8, %v2062_v40, %v1939_v55 }
 0x3b0   :  { %2192 = vst.msk [vmem:[%s3942_s14 + $0x78] sm:$0xff] %vm2176_vm9, %v2159_v14 }
 0x3b4   :  { %v1941_v28 = vpop.f32.mrf.mxu3 }
 0x3b5   :  { %v1942_v17 = vadd.f32 %v3687_v34, %v1941_v28  ;;  %v2142_v28 = vpop.permute.xlu1 %2141 }
 0x3b7   :  { %v2160_v6 = vsel %vm1983_vm8, %v2067_v18, %v1942_v17 }
 0x3b8   :  { %2193 = vst.msk [vmem:[%s3942_s14 + $0x80] sm:$0xff] %vm2176_vm9, %v2160_v6 }
 0x3bc   :  { %v1943_v0 = vpop.f32.mrf.mxu3 }
 0x3bd   :  { %v1944_v16 = vadd.f32 %v3687_v34, %v1943_v0 }
 0x3bf   :  { %v2161_v54 = vsel %vm1983_vm8, %v2072_v22, %v1944_v16 }
 0x3c0   :  { %2194 = vst.msk [vmem:[%s3942_s14 + $0x88] sm:$0xff] %vm2176_vm9, %v2161_v54 }
 0x3c4   :  { %v1946_v35 = vpop.f32.mrf.mxu3 }
 0x3c5   :  { %v1947_v32 = vadd.f32 %v3687_v34, %v1946_v35 }
 0x3c7   :  { %v2162_v20 = vsel %vm1983_vm8, %v2077_v5, %v1947_v32 }
 0x3c8   :  { %2195 = vst.msk [vmem:[%s3942_s14 + $0x90] sm:$0xff] %vm2176_vm9, %v2162_v20 }
 0x3cc   :  { %v1948_v62 = vpop.f32.mrf.mxu3 }
 0x3cd   :  { %v1949_v37 = vadd.f32 %v3687_v34, %v1948_v62 }
 0x3cf   :  { %v2163_v10 = vsel %vm1983_vm8, %v2082_v21, %v1949_v37 }
 0x3d0   :  { %2196 = vst.msk [vmem:[%s3942_s14 + $0x98] sm:$0xff] %vm2176_vm9, %v2163_v10 }
 0x3d4   :  { %v1951_v38 = vpop.f32.mrf.mxu3 }
 0x3d5   :  { %v1952_v27 = vadd.f32 %v3687_v34, %v1951_v38 }
 0x3d7   :  { %v2164_v13 = vsel %vm1983_vm8, %v2087_v39, %v1952_v27 }
 0x3d8   :  { %2197 = vst.msk [vmem:[%s3942_s14 + $0xa0] sm:$0xff] %vm2176_vm9, %v2164_v13 }
 0x3dc   :  { %v1953_v15 = vpop.f32.mrf.mxu3 }
 0x3dd   :  { %v1954_v7 = vadd.f32 %v3687_v34, %v1953_v15 }
 0x3df   :  { %v2165_v12 = vsel %vm1983_vm8, %v2092_v61, %v1954_v7 }
 0x3e0   :  { %2198 = vst.msk [vmem:[%s3942_s14 + $0xa8] sm:$0xff] %vm2176_vm9, %v2165_v12 }
 0x3e4   :  { %v1956_v26 = vpop.f32.mrf.mxu3 }
 0x3e5   :  { %v1957_v60 = vadd.f32 %v3687_v34, %v1956_v26 }
 0x3e7   :  { %v2166_v45 = vsel %vm1983_vm8, %v2097_v50, %v1957_v60 }
 0x3e8   :  { %2199 = vst.msk [vmem:[%s3942_s14 + $0xb0] sm:$0xff] %vm2176_vm9, %v2166_v45 }
 0x3ec   :  { %v1958_v44 = vpop.f32.mrf.mxu3 }
 0x3ed   :  { %v1959_v42 = vadd.f32 %v3687_v34, %v1958_v44 }
 0x3ef   :  { %v2167_v9 = vsel %vm1983_vm8, %v2102_v4, %v1959_v42 }
 0x3f0   :  { %2200 = vst.msk [vmem:[%s3942_s14 + $0xb8] sm:$0xff] %vm2176_vm9, %v2167_v9 }
 0x3f4   :  { %v1961_v24 = vpop.f32.mrf.mxu3 }
 0x3f5   :  { %v1962_v8 = vadd.f32 %v3687_v34, %v1961_v24 }
 0x3f7   :  { %v2168_v48 = vsel %vm1983_vm8, %v2107_v58, %v1962_v8 }
 0x3f8   :  { %2201 = vst.msk [vmem:[%s3942_s14 + $0xc0] sm:$0xff] %vm2176_vm9, %v2168_v48 }
 0x3fc   :  { %v1963_v29 = vpop.f32.mrf.mxu3 }
 0x3fd   :  { %v1964_v19 = vadd.f32 %v3687_v34, %v1963_v29 }
 0x3ff   :  { %v2169_v56 = vsel %vm1983_vm8, %v2112_v43, %v1964_v19 }
 0x400   :  { %2202 = vst.msk [vmem:[%s3942_s14 + $0xc8] sm:$0xff] %vm2176_vm9, %v2169_v56 }
 0x404   :  { %v1966_v30 = vpop.f32.mrf.mxu3 }
 0x405   :  { %v1967_v49 = vadd.f32 %v3687_v34, %v1966_v30 }
 0x407   :  { %v2170_v63 = vsel %vm1983_vm8, %v2117_v11, %v1967_v49 }
 0x408   :  { %2203 = vst.msk [vmem:[%s3942_s14 + $0xd0] sm:$0xff] %vm2176_vm9, %v2170_v63 }
 0x40c   :  { %v1968_v47 = vpop.f32.mrf.mxu3 }
 0x40d   :  { %v1969_v3 = vadd.f32 %v3687_v34, %v1968_v47 }
 0x40f   :  { %v2171_v51 = vsel %vm1983_vm8, %v2122_v33, %v1969_v3 }
 0x410   :  { %2204 = vst.msk [vmem:[%s3942_s14 + $0xd8] sm:$0xff] %vm2176_vm9, %v2171_v51 }
 0x414   :  { %v1971_v41 = vpop.f32.mrf.mxu3 }
 0x415   :  { %v1972_v57 = vadd.f32 %v3687_v34, %v1971_v41 }
 0x417   :  { %v2172_v2 = vsel %vm1983_vm8, %v2127_v31, %v1972_v57 }
 0x418   :  { %2205 = vst.msk [vmem:[%s3942_s14 + $0xe0] sm:$0xff] %vm2176_vm9, %v2172_v2 }
 0x41c   :  { %v1973_v52 = vpop.f32.mrf.mxu3 }
 0x41d   :  { %v1974_v53 = vadd.f32 %v3687_v34, %v1973_v52 }
 0x41f   :  { %v2173_v1 = vsel %vm1983_vm8, %v2132_v59, %v1974_v53 }
 0x420   :  { %2206 = vst.msk [vmem:[%s3942_s14 + $0xe8] sm:$0xff] %vm2176_vm9, %v2173_v1 }
 0x424   :  { %v1976_v25 = vpop.f32.mrf.mxu3 }
 0x425   :  { %v1977_v46 = vadd.f32 %v3687_v34, %v1976_v25 }
 0x427   :  { %v2174_v55 = vsel %vm1983_vm8, %v2137_v23, %v1977_v46 }
 0x428   :  { %2207 = vst.msk [vmem:[%s3942_s14 + $0xf0] sm:$0xff] %vm2176_vm9, %v2174_v55 }
 0x42c   :  { %v1978_v40 = vpop.f32.mrf.mxu3 }
 0x42d   :  { %v1979_v14 = vadd.f32 %v3687_v34, %v1978_v40 }
 0x42f   :  { %v2175_v17 = vsel %vm1983_vm8, %v2142_v28, %v1979_v14 }
 0x430   :  { %2208 = vst.msk [vmem:[%s3942_s14 + $0xf8] sm:$0xff] %vm2176_vm9, %v2175_v17 }

</bundles_post_ra>
